<compile_context>
chip_gen: v6e
topology: v6e:2x2x1
jax: 0.10.0
libtpu: 0.0.40
codegen_flags: <defaults>
</compile_context>

<pallas_src>
import functools

import jax
import jax.numpy as jnp
from jax.experimental import pallas as pl
from jax.experimental.pallas import tpu as pltpu

# ----------------------------- config ---------------------------------------
BATCH = 2
Q_LEN = 8
KV_LEN = 16
HIDDEN = 32          # embed_dim
NUM_HEADS = 4
HEAD_DIM = HIDDEN // NUM_HEADS
LN_EPS = 1e-6
SCALE = HEAD_DIM ** -0.5


# ------------------------- fully fused kernel -------------------------------
def _fused_kernel(h_ref, x_ref, qw_ref, qb_ref, kvw_ref, kvb_ref,
                  ow_ref, ob_ref, ln_ref, o_ref,
                  *, b, sq, skv, nh, d, eps, scale):
    e = nh * d

    hs = h_ref[...].astype(jnp.float32)          # (b*sq,  e)
    xs = x_ref[...].astype(jnp.float32)          # (b*skv, e)

    # --- projections (q separate; k and v fused into one (e, 2e) matmul) ---
    q = jnp.dot(hs, qw_ref[...], preferred_element_type=jnp.float32) + qb_ref[...]
    kv = jnp.dot(xs, kvw_ref[...], preferred_element_type=jnp.float32) + kvb_ref[...]
    k = kv[:, :e]                                # (b*skv, e)
    v = kv[:, e:]                                # (b*skv, e)

    # --- packed LayerNorm params: rows = [q_gamma, q_beta, k_gamma, k_beta] ---
    ln = ln_ref[...]                             # (4, d)
    q_gamma, q_beta = ln[0:1, :], ln[1:2, :]
    k_gamma, k_beta = ln[2:3, :], ln[3:4, :]

    def layer_norm(x, gamma, beta):
        mean = jnp.mean(x, axis=-1, keepdims=True)
        var = jnp.mean((x - mean) ** 2, axis=-1, keepdims=True)
        return (x - mean) * jax.lax.rsqrt(var + eps) * gamma + beta

    # --- per-head attention (static unrolled loop, heads are lane slices) ---
    head_outs = []
    for hd in range(nh):
        lo, hi = hd * d, (hd + 1) * d
        q_h = layer_norm(q[:, lo:hi], q_gamma, q_beta).reshape(b, sq, d)
        k_h = layer_norm(k[:, lo:hi], k_gamma, k_beta).reshape(b, skv, d)
        v_h = v[:, lo:hi].reshape(b, skv, d)

        # scores: contract shared minor D axis (no materialized k transpose)
        s = jnp.einsum("bqd,bkd->bqk", q_h, k_h,
                       preferred_element_type=jnp.float32) * scale
        m = jnp.max(s, axis=-1, keepdims=True)
        p = jnp.exp(s - m)
        denom = jnp.sum(p, axis=-1, keepdims=True)
        # approx=False keeps the softmax bit-close to the reference; at these
        # shapes the EUP reciprocal would not change wall-clock anyway.
        p = p * pl.reciprocal(denom, approx=False)

        o_h = jnp.einsum("bqk,bkd->bqd", p, v_h,
                         preferred_element_type=jnp.float32)
        head_outs.append(o_h.reshape(b * sq, d))

    # --- merge heads (lane-dense (b*sq, e) slab) + output projection ---
    attn = jnp.concatenate(head_outs, axis=-1)   # (b*sq, e)
    out = jnp.dot(attn, ow_ref[...], preferred_element_type=jnp.float32) + ob_ref[...]
    o_ref[...] = out.astype(o_ref.dtype)


def cross_flash_attention2(hidden_states, cross_attention_states, params):
    """hidden_states: (B, Sq, E), cross_attention_states: (B, Skv, E)."""
    bsz, q_len, embed = hidden_states.shape
    kv_len = cross_attention_states.shape[1]

    h2d = hidden_states.reshape(bsz * q_len, embed)
    x2d = cross_attention_states.reshape(bsz * kv_len, embed)

    # fuse k/v projection weights and pack LN params (tiny host-side concats)
    kv_w = jnp.concatenate([params["k_w"], params["v_w"]], axis=1)   # (E, 2E)
    kv_b = jnp.concatenate([params["k_b"], params["v_b"]], axis=1)   # (1, 2E)
    ln = jnp.concatenate([params["q_gamma"], params["q_beta"],
                          params["k_gamma"], params["k_beta"]], axis=0)  # (4, D)

    kernel = functools.partial(
        _fused_kernel, b=bsz, sq=q_len, skv=kv_len,
        nh=NUM_HEADS, d=HEAD_DIM, eps=LN_EPS, scale=SCALE)

    def full_spec(shape):
        return pl.BlockSpec(shape, lambda i, _s=shape: (0,) * len(_s))

    out = pl.pallas_call(
        kernel,
        out_shape=jax.ShapeDtypeStruct((bsz * q_len, embed), hidden_states.dtype),
        grid=(1,),
        in_specs=[
            full_spec(h2d.shape),                 # hidden_states (B*Sq, E)
            full_spec(x2d.shape),                 # cross states  (B*Skv, E)
            full_spec(params["q_w"].shape),       # q_proj weight (E, E)
            full_spec(params["q_b"].shape),       # q_proj bias   (1, E)
            full_spec(kv_w.shape),                # fused k|v weight (E, 2E)
            full_spec(kv_b.shape),                # fused k|v bias   (1, 2E)
            full_spec(params["o_w"].shape),       # out_proj weight (E, E)
            full_spec(params["o_b"].shape),       # out_proj bias   (1, E)
            full_spec(ln.shape),                  # packed LN params (4, D)
        ],
        out_specs=full_spec((bsz * q_len, embed)),
        compiler_params=pltpu.CompilerParams(
            dimension_semantics=("arbitrary",)),
    )(h2d, x2d, params["q_w"], params["q_b"], kv_w, kv_b,
      params["o_w"], params["o_b"], ln)

    attn_weights = None  # output_attentions is forced False in the flash path
    return out.reshape(bsz, q_len, embed), attn_weights


# ----------------------------- reference ------------------------------------
def reference(hidden_states, cross_attention_states, params):
    bsz, q_len, embed = hidden_states.shape
    kv_len = cross_attention_states.shape[1]
    h, d = NUM_HEADS, HEAD_DIM

    q = hidden_states @ params["q_w"] + params["q_b"]
    k = cross_attention_states @ params["k_w"] + params["k_b"]
    v = cross_attention_states @ params["v_w"] + params["v_b"]
    q = q.reshape(bsz, q_len, h, d).transpose(0, 2, 1, 3)
    k = k.reshape(bsz, kv_len, h, d).transpose(0, 2, 1, 3)
    v = v.reshape(bsz, kv_len, h, d).transpose(0, 2, 1, 3)

    def ln(x, g, b):
        m = x.mean(-1, keepdims=True)
        var = ((x - m) ** 2).mean(-1, keepdims=True)
        return (x - m) / jnp.sqrt(var + LN_EPS) * g.reshape(d) + b.reshape(d)

    q = ln(q, params["q_gamma"], params["q_beta"])
    k = ln(k, params["k_gamma"], params["k_beta"])

    s = jnp.einsum("bhqd,bhkd->bhqk", q, k) * SCALE
    a = jax.nn.softmax(s.astype(jnp.float32), axis=-1)
    o = jnp.einsum("bhqk,bhkd->bhqd", a, v)
    o = o.transpose(0, 2, 1, 3).reshape(bsz, q_len, embed)
    return o @ params["o_w"] + params["o_b"]


# ----------------------------- main -----------------------------------------
def make_params(key):
    ks = jax.random.split(key, 12)
    s = 0.05
    e, d = HIDDEN, HEAD_DIM
    # weights stored pre-transposed: (in_features, out_features)
    return {
        "q_w": jax.random.normal(ks[0], (e, e), jnp.float32) * s,
        "q_b": jax.random.normal(ks[1], (1, e), jnp.float32) * s,
        "k_w": jax.random.normal(ks[2], (e, e), jnp.float32) * s,
        "k_b": jax.random.normal(ks[3], (1, e), jnp.float32) * s,
        "v_w": jax.random.normal(ks[4], (e, e), jnp.float32) * s,
        "v_b": jax.random.normal(ks[5], (1, e), jnp.float32) * s,
        "o_w": jax.random.normal(ks[6], (e, e), jnp.float32) * s,
        "o_b": jax.random.normal(ks[7], (1, e), jnp.float32) * s,
        "q_gamma": 1.0 + 0.1 * jax.random.normal(ks[8], (1, d), jnp.float32),
        "q_beta": 0.1 * jax.random.normal(ks[9], (1, d), jnp.float32),
        "k_gamma": 1.0 + 0.1 * jax.random.normal(ks[10], (1, d), jnp.float32),
        "k_beta": 0.1 * jax.random.normal(ks[11], (1, d), jnp.float32),
    }


if __name__ == "__main__":
    key = jax.random.PRNGKey(0)
    k_h, k_x, k_p = jax.random.split(key, 3)

    hidden_states = jax.random.normal(k_h, (BATCH, Q_LEN, HIDDEN), jnp.float32)
    cross_states = jax.random.normal(k_x, (BATCH, KV_LEN, HIDDEN), jnp.float32)
    params = make_params(k_p)

    out, attn_w = cross_flash_attention2(hidden_states, cross_states, params)
    out = jax.block_until_ready(out)

    ref = reference(hidden_states, cross_states, params)
    assert out.shape == (BATCH, Q_LEN, HIDDEN)
    assert jnp.allclose(out, ref, atol=1e-4, rtol=1e-4), \
        f"max abs err {jnp.max(jnp.abs(out - ref))}"

    print("KERNEL_OK")
</pallas_src>

<mosaic_0001>
module attributes {stable_mosaic.version = 11 : i64} {
  func.func @_fused_kernel(%arg0: i32, %arg1: memref<16x32xf32, #tpu.memory_space<vmem>>, %arg2: memref<32x32xf32, #tpu.memory_space<vmem>>, %arg3: memref<32x32xf32, #tpu.memory_space<vmem>>, %arg4: memref<1x32xf32, #tpu.memory_space<vmem>>, %arg5: memref<32x64xf32, #tpu.memory_space<vmem>>, %arg6: memref<1x64xf32, #tpu.memory_space<vmem>>, %arg7: memref<32x32xf32, #tpu.memory_space<vmem>>, %arg8: memref<1x32xf32, #tpu.memory_space<vmem>>, %arg9: memref<4x8xf32, #tpu.memory_space<vmem>>, %arg10: memref<16x32xf32, #tpu.memory_space<vmem>>) attributes {dimension_semantics = [#tpu.dimension_semantics<arbitrary>], iteration_bounds = array<i64: 1>, scalar_prefetch = 0 : i64, scratch_operands = 0 : i64, tpu.core_type = #tpu.core_type<tc>, window_params = [{pipeline_mode = #tpu.pipeline_mode<synchronous>, transform_indices = @transform_0, window_bounds = array<i64: 16, 32>}, {pipeline_mode = #tpu.pipeline_mode<synchronous>, transform_indices = @transform_1, window_bounds = array<i64: 32, 32>}, {pipeline_mode = #tpu.pipeline_mode<synchronous>, transform_indices = @transform_2, window_bounds = array<i64: 32, 32>}, {pipeline_mode = #tpu.pipeline_mode<synchronous>, transform_indices = @transform_3, window_bounds = array<i64: 1, 32>}, {pipeline_mode = #tpu.pipeline_mode<synchronous>, transform_indices = @transform_4, window_bounds = array<i64: 32, 64>}, {pipeline_mode = #tpu.pipeline_mode<synchronous>, transform_indices = @transform_5, window_bounds = array<i64: 1, 64>}, {pipeline_mode = #tpu.pipeline_mode<synchronous>, transform_indices = @transform_6, window_bounds = array<i64: 32, 32>}, {pipeline_mode = #tpu.pipeline_mode<synchronous>, transform_indices = @transform_7, window_bounds = array<i64: 1, 32>}, {pipeline_mode = #tpu.pipeline_mode<synchronous>, transform_indices = @transform_8, window_bounds = array<i64: 4, 8>}, {pipeline_mode = #tpu.pipeline_mode<synchronous>, transform_indices = @transform_9, window_bounds = array<i64: 16, 32>}]} {
    %c0 = arith.constant 0 : index
    %c0_0 = arith.constant 0 : index
    %0 = vector.load %arg1[%c0, %c0_0] : memref<16x32xf32, #tpu.memory_space<vmem>>, vector<16x32xf32>
    %c0_1 = arith.constant 0 : index
    %c0_2 = arith.constant 0 : index
    %1 = vector.load %arg2[%c0_1, %c0_2] : memref<32x32xf32, #tpu.memory_space<vmem>>, vector<32x32xf32>
    %c0_3 = arith.constant 0 : index
    %c0_4 = arith.constant 0 : index
    %2 = vector.load %arg3[%c0_3, %c0_4] : memref<32x32xf32, #tpu.memory_space<vmem>>, vector<32x32xf32>
    %cst = arith.constant dense<0.000000e+00> : vector<16x32xf32>
    %3 = tpu.matmul %0, %2, %cst {dimension_numbers = #tpu.dot_dimension_numbers<[1], [0], [0], [1], [0, 0, 1, 1], [], []>} : vector<16x32xf32>, vector<32x32xf32>, vector<16x32xf32> -> vector<16x32xf32>
    %c0_5 = arith.constant 0 : index
    %c0_6 = arith.constant 0 : index
    %4 = vector.load %arg4[%c0_5, %c0_6] : memref<1x32xf32, #tpu.memory_space<vmem>>, vector<1x32xf32>
    %5 = vector.broadcast %4 : vector<1x32xf32> to vector<16x32xf32>
    %6 = arith.addf %3, %5 : vector<16x32xf32>
    %c0_7 = arith.constant 0 : index
    %c0_8 = arith.constant 0 : index
    %7 = vector.load %arg5[%c0_7, %c0_8] : memref<32x64xf32, #tpu.memory_space<vmem>>, vector<32x64xf32>
    %cst_9 = arith.constant dense<0.000000e+00> : vector<32x64xf32>
    %8 = tpu.matmul %1, %7, %cst_9 {dimension_numbers = #tpu.dot_dimension_numbers<[1], [0], [0], [1], [0, 0, 1, 1], [], []>} : vector<32x32xf32>, vector<32x64xf32>, vector<32x64xf32> -> vector<32x64xf32>
    %c0_10 = arith.constant 0 : index
    %c0_11 = arith.constant 0 : index
    %9 = vector.load %arg6[%c0_10, %c0_11] : memref<1x64xf32, #tpu.memory_space<vmem>>, vector<1x64xf32>
    %10 = vector.broadcast %9 : vector<1x64xf32> to vector<32x64xf32>
    %11 = arith.addf %8, %10 : vector<32x64xf32>
    %12 = vector.extract_strided_slice %11 {offsets = [0, 0], sizes = [32, 32], strides = [1, 1]} : vector<32x64xf32> to vector<32x32xf32>
    %13 = vector.extract_strided_slice %11 {offsets = [0, 32], sizes = [32, 32], strides = [1, 1]} : vector<32x64xf32> to vector<32x32xf32>
    %c0_12 = arith.constant 0 : index
    %c0_13 = arith.constant 0 : index
    %14 = vector.load %arg9[%c0_12, %c0_13] : memref<4x8xf32, #tpu.memory_space<vmem>>, vector<4x8xf32>
    %15 = vector.extract_strided_slice %14 {offsets = [0, 0], sizes = [1, 8], strides = [1, 1]} : vector<4x8xf32> to vector<1x8xf32>
    %16 = vector.extract_strided_slice %14 {offsets = [1, 0], sizes = [1, 8], strides = [1, 1]} : vector<4x8xf32> to vector<1x8xf32>
    %17 = vector.extract_strided_slice %14 {offsets = [2, 0], sizes = [1, 8], strides = [1, 1]} : vector<4x8xf32> to vector<1x8xf32>
    %18 = vector.extract_strided_slice %14 {offsets = [3, 0], sizes = [1, 8], strides = [1, 1]} : vector<4x8xf32> to vector<1x8xf32>
    %19 = vector.extract_strided_slice %6 {offsets = [0, 0], sizes = [16, 8], strides = [1, 1]} : vector<16x32xf32> to vector<16x8xf32>
    %cst_14 = arith.constant dense<0.000000e+00> : vector<16xf32>
    %20 = vector.multi_reduction <add>, %19, %cst_14 [1] : vector<16x8xf32> to vector<16xf32>
    %21 = vector.shape_cast %20 : vector<16xf32> to vector<16x1xf32>
    %cst_15 = arith.constant 8.000000e+00 : f32
    %22 = vector.broadcast %cst_15 : f32 to vector<16x1xf32>
    %23 = arith.divf %21, %22 : vector<16x1xf32>
    %24 = vector.broadcast %23 : vector<16x1xf32> to vector<16x8xf32>
    %25 = arith.subf %19, %24 : vector<16x8xf32>
    %26 = arith.mulf %25, %25 : vector<16x8xf32>
    %cst_16 = arith.constant dense<0.000000e+00> : vector<16xf32>
    %27 = vector.multi_reduction <add>, %26, %cst_16 [1] : vector<16x8xf32> to vector<16xf32>
    %28 = vector.shape_cast %27 : vector<16xf32> to vector<16x1xf32>
    %cst_17 = arith.constant 8.000000e+00 : f32
    %29 = vector.broadcast %cst_17 : f32 to vector<16x1xf32>
    %30 = arith.divf %28, %29 : vector<16x1xf32>
    %31 = vector.broadcast %23 : vector<16x1xf32> to vector<16x8xf32>
    %32 = arith.subf %19, %31 : vector<16x8xf32>
    %cst_18 = arith.constant 9.99999997E-7 : f32
    %33 = vector.broadcast %cst_18 : f32 to vector<16x1xf32>
    %34 = arith.addf %30, %33 : vector<16x1xf32>
    %35 = math.rsqrt %34 : vector<16x1xf32>
    %36 = vector.broadcast %35 : vector<16x1xf32> to vector<16x8xf32>
    %37 = arith.mulf %32, %36 : vector<16x8xf32>
    %38 = vector.broadcast %15 : vector<1x8xf32> to vector<16x8xf32>
    %39 = arith.mulf %37, %38 : vector<16x8xf32>
    %40 = vector.broadcast %16 : vector<1x8xf32> to vector<16x8xf32>
    %41 = arith.addf %39, %40 : vector<16x8xf32>
    %42 = vector.shape_cast %41 : vector<16x8xf32> to vector<2x8x8xf32>
    %43 = vector.extract_strided_slice %12 {offsets = [0, 0], sizes = [32, 8], strides = [1, 1]} : vector<32x32xf32> to vector<32x8xf32>
    %cst_19 = arith.constant dense<0.000000e+00> : vector<32xf32>
    %44 = vector.multi_reduction <add>, %43, %cst_19 [1] : vector<32x8xf32> to vector<32xf32>
    %45 = vector.shape_cast %44 : vector<32xf32> to vector<32x1xf32>
    %cst_20 = arith.constant 8.000000e+00 : f32
    %46 = vector.broadcast %cst_20 : f32 to vector<32x1xf32>
    %47 = arith.divf %45, %46 : vector<32x1xf32>
    %48 = vector.broadcast %47 : vector<32x1xf32> to vector<32x8xf32>
    %49 = arith.subf %43, %48 : vector<32x8xf32>
    %50 = arith.mulf %49, %49 : vector<32x8xf32>
    %cst_21 = arith.constant dense<0.000000e+00> : vector<32xf32>
    %51 = vector.multi_reduction <add>, %50, %cst_21 [1] : vector<32x8xf32> to vector<32xf32>
    %52 = vector.shape_cast %51 : vector<32xf32> to vector<32x1xf32>
    %cst_22 = arith.constant 8.000000e+00 : f32
    %53 = vector.broadcast %cst_22 : f32 to vector<32x1xf32>
    %54 = arith.divf %52, %53 : vector<32x1xf32>
    %55 = vector.broadcast %47 : vector<32x1xf32> to vector<32x8xf32>
    %56 = arith.subf %43, %55 : vector<32x8xf32>
    %cst_23 = arith.constant 9.99999997E-7 : f32
    %57 = vector.broadcast %cst_23 : f32 to vector<32x1xf32>
    %58 = arith.addf %54, %57 : vector<32x1xf32>
    %59 = math.rsqrt %58 : vector<32x1xf32>
    %60 = vector.broadcast %59 : vector<32x1xf32> to vector<32x8xf32>
    %61 = arith.mulf %56, %60 : vector<32x8xf32>
    %62 = vector.broadcast %17 : vector<1x8xf32> to vector<32x8xf32>
    %63 = arith.mulf %61, %62 : vector<32x8xf32>
    %64 = vector.broadcast %18 : vector<1x8xf32> to vector<32x8xf32>
    %65 = arith.addf %63, %64 : vector<32x8xf32>
    %66 = vector.shape_cast %65 : vector<32x8xf32> to vector<2x16x8xf32>
    %67 = vector.extract_strided_slice %13 {offsets = [0, 0], sizes = [32, 8], strides = [1, 1]} : vector<32x32xf32> to vector<32x8xf32>
    %68 = vector.shape_cast %67 : vector<32x8xf32> to vector<2x16x8xf32>
    "tpu.trace_start"() <{level = 10 : i32, message = "bqd,bkd->bqk"}> : () -> ()
    %cst_24 = arith.constant dense<0.000000e+00> : vector<2x8x16xf32>
    %69 = tpu.matmul %42, %66, %cst_24 {dimension_numbers = #tpu.dot_dimension_numbers<[2], [2], [1], [1], [0, 0, 0, 1, 1, 1], [0], [0]>} : vector<2x8x8xf32>, vector<2x16x8xf32>, vector<2x8x16xf32> -> vector<2x8x16xf32>
    "tpu.trace_stop"() : () -> ()
    %cst_25 = arith.constant 0.353553385 : f32
    %70 = vector.broadcast %cst_25 : f32 to vector<2x8x16xf32>
    %71 = arith.mulf %69, %70 : vector<2x8x16xf32>
    %cst_26 = arith.constant dense<0xFF800000> : vector<2x8xf32>
    %72 = vector.multi_reduction <maximumf>, %71, %cst_26 [2] : vector<2x8x16xf32> to vector<2x8xf32>
    %73 = vector.shape_cast %72 : vector<2x8xf32> to vector<2x8x1xf32>
    %74 = vector.broadcast %73 : vector<2x8x1xf32> to vector<2x8x16xf32>
    %75 = arith.subf %71, %74 : vector<2x8x16xf32>
    %76 = math.exp %75 : vector<2x8x16xf32>
    %cst_27 = arith.constant dense<0.000000e+00> : vector<2x8xf32>
    %77 = vector.multi_reduction <add>, %76, %cst_27 [2] : vector<2x8x16xf32> to vector<2x8xf32>
    %78 = vector.shape_cast %77 : vector<2x8xf32> to vector<2x8x1xf32>
    %79 = tpu.reciprocal %78 : vector<2x8x1xf32> -> vector<2x8x1xf32>
    %80 = vector.broadcast %79 : vector<2x8x1xf32> to vector<2x8x16xf32>
    %81 = arith.mulf %76, %80 : vector<2x8x16xf32>
    "tpu.trace_start"() <{level = 10 : i32, message = "bqk,bkd->bqd"}> : () -> ()
    %cst_28 = arith.constant dense<0.000000e+00> : vector<2x8x8xf32>
    %82 = tpu.matmul %81, %68, %cst_28 {dimension_numbers = #tpu.dot_dimension_numbers<[2], [1], [1], [2], [0, 0, 0, 1, 1, 2], [0], [0]>} : vector<2x8x16xf32>, vector<2x16x8xf32>, vector<2x8x8xf32> -> vector<2x8x8xf32>
    "tpu.trace_stop"() : () -> ()
    %83 = vector.shape_cast %82 : vector<2x8x8xf32> to vector<16x8xf32>
    %84 = vector.extract_strided_slice %6 {offsets = [0, 8], sizes = [16, 8], strides = [1, 1]} : vector<16x32xf32> to vector<16x8xf32>
    %cst_29 = arith.constant dense<0.000000e+00> : vector<16xf32>
    %85 = vector.multi_reduction <add>, %84, %cst_29 [1] : vector<16x8xf32> to vector<16xf32>
    %86 = vector.shape_cast %85 : vector<16xf32> to vector<16x1xf32>
    %cst_30 = arith.constant 8.000000e+00 : f32
    %87 = vector.broadcast %cst_30 : f32 to vector<16x1xf32>
    %88 = arith.divf %86, %87 : vector<16x1xf32>
    %89 = vector.broadcast %88 : vector<16x1xf32> to vector<16x8xf32>
    %90 = arith.subf %84, %89 : vector<16x8xf32>
    %91 = arith.mulf %90, %90 : vector<16x8xf32>
    %cst_31 = arith.constant dense<0.000000e+00> : vector<16xf32>
    %92 = vector.multi_reduction <add>, %91, %cst_31 [1] : vector<16x8xf32> to vector<16xf32>
    %93 = vector.shape_cast %92 : vector<16xf32> to vector<16x1xf32>
    %cst_32 = arith.constant 8.000000e+00 : f32
    %94 = vector.broadcast %cst_32 : f32 to vector<16x1xf32>
    %95 = arith.divf %93, %94 : vector<16x1xf32>
    %96 = vector.broadcast %88 : vector<16x1xf32> to vector<16x8xf32>
    %97 = arith.subf %84, %96 : vector<16x8xf32>
    %cst_33 = arith.constant 9.99999997E-7 : f32
    %98 = vector.broadcast %cst_33 : f32 to vector<16x1xf32>
    %99 = arith.addf %95, %98 : vector<16x1xf32>
    %100 = math.rsqrt %99 : vector<16x1xf32>
    %101 = vector.broadcast %100 : vector<16x1xf32> to vector<16x8xf32>
    %102 = arith.mulf %97, %101 : vector<16x8xf32>
    %103 = vector.broadcast %15 : vector<1x8xf32> to vector<16x8xf32>
    %104 = arith.mulf %102, %103 : vector<16x8xf32>
    %105 = vector.broadcast %16 : vector<1x8xf32> to vector<16x8xf32>
    %106 = arith.addf %104, %105 : vector<16x8xf32>
    %107 = vector.shape_cast %106 : vector<16x8xf32> to vector<2x8x8xf32>
    %108 = vector.extract_strided_slice %12 {offsets = [0, 8], sizes = [32, 8], strides = [1, 1]} : vector<32x32xf32> to vector<32x8xf32>
    %cst_34 = arith.constant dense<0.000000e+00> : vector<32xf32>
    %109 = vector.multi_reduction <add>, %108, %cst_34 [1] : vector<32x8xf32> to vector<32xf32>
    %110 = vector.shape_cast %109 : vector<32xf32> to vector<32x1xf32>
    %cst_35 = arith.constant 8.000000e+00 : f32
    %111 = vector.broadcast %cst_35 : f32 to vector<32x1xf32>
    %112 = arith.divf %110, %111 : vector<32x1xf32>
    %113 = vector.broadcast %112 : vector<32x1xf32> to vector<32x8xf32>
    %114 = arith.subf %108, %113 : vector<32x8xf32>
    %115 = arith.mulf %114, %114 : vector<32x8xf32>
    %cst_36 = arith.constant dense<0.000000e+00> : vector<32xf32>
    %116 = vector.multi_reduction <add>, %115, %cst_36 [1] : vector<32x8xf32> to vector<32xf32>
    %117 = vector.shape_cast %116 : vector<32xf32> to vector<32x1xf32>
    %cst_37 = arith.constant 8.000000e+00 : f32
    %118 = vector.broadcast %cst_37 : f32 to vector<32x1xf32>
    %119 = arith.divf %117, %118 : vector<32x1xf32>
    %120 = vector.broadcast %112 : vector<32x1xf32> to vector<32x8xf32>
    %121 = arith.subf %108, %120 : vector<32x8xf32>
    %cst_38 = arith.constant 9.99999997E-7 : f32
    %122 = vector.broadcast %cst_38 : f32 to vector<32x1xf32>
    %123 = arith.addf %119, %122 : vector<32x1xf32>
    %124 = math.rsqrt %123 : vector<32x1xf32>
    %125 = vector.broadcast %124 : vector<32x1xf32> to vector<32x8xf32>
    %126 = arith.mulf %121, %125 : vector<32x8xf32>
    %127 = vector.broadcast %17 : vector<1x8xf32> to vector<32x8xf32>
    %128 = arith.mulf %126, %127 : vector<32x8xf32>
    %129 = vector.broadcast %18 : vector<1x8xf32> to vector<32x8xf32>
    %130 = arith.addf %128, %129 : vector<32x8xf32>
    %131 = vector.shape_cast %130 : vector<32x8xf32> to vector<2x16x8xf32>
    %132 = vector.extract_strided_slice %13 {offsets = [0, 8], sizes = [32, 8], strides = [1, 1]} : vector<32x32xf32> to vector<32x8xf32>
    %133 = vector.shape_cast %132 : vector<32x8xf32> to vector<2x16x8xf32>
    "tpu.trace_start"() <{level = 10 : i32, message = "bqd,bkd->bqk"}> : () -> ()
    %cst_39 = arith.constant dense<0.000000e+00> : vector<2x8x16xf32>
    %134 = tpu.matmul %107, %131, %cst_39 {dimension_numbers = #tpu.dot_dimension_numbers<[2], [2], [1], [1], [0, 0, 0, 1, 1, 1], [0], [0]>} : vector<2x8x8xf32>, vector<2x16x8xf32>, vector<2x8x16xf32> -> vector<2x8x16xf32>
    "tpu.trace_stop"() : () -> ()
    %cst_40 = arith.constant 0.353553385 : f32
    %135 = vector.broadcast %cst_40 : f32 to vector<2x8x16xf32>
    %136 = arith.mulf %134, %135 : vector<2x8x16xf32>
    %cst_41 = arith.constant dense<0xFF800000> : vector<2x8xf32>
    %137 = vector.multi_reduction <maximumf>, %136, %cst_41 [2] : vector<2x8x16xf32> to vector<2x8xf32>
    %138 = vector.shape_cast %137 : vector<2x8xf32> to vector<2x8x1xf32>
    %139 = vector.broadcast %138 : vector<2x8x1xf32> to vector<2x8x16xf32>
    %140 = arith.subf %136, %139 : vector<2x8x16xf32>
    %141 = math.exp %140 : vector<2x8x16xf32>
    %cst_42 = arith.constant dense<0.000000e+00> : vector<2x8xf32>
    %142 = vector.multi_reduction <add>, %141, %cst_42 [2] : vector<2x8x16xf32> to vector<2x8xf32>
    %143 = vector.shape_cast %142 : vector<2x8xf32> to vector<2x8x1xf32>
    %144 = tpu.reciprocal %143 : vector<2x8x1xf32> -> vector<2x8x1xf32>
    %145 = vector.broadcast %144 : vector<2x8x1xf32> to vector<2x8x16xf32>
    %146 = arith.mulf %141, %145 : vector<2x8x16xf32>
    "tpu.trace_start"() <{level = 10 : i32, message = "bqk,bkd->bqd"}> : () -> ()
    %cst_43 = arith.constant dense<0.000000e+00> : vector<2x8x8xf32>
    %147 = tpu.matmul %146, %133, %cst_43 {dimension_numbers = #tpu.dot_dimension_numbers<[2], [1], [1], [2], [0, 0, 0, 1, 1, 2], [0], [0]>} : vector<2x8x16xf32>, vector<2x16x8xf32>, vector<2x8x8xf32> -> vector<2x8x8xf32>
    "tpu.trace_stop"() : () -> ()
    %148 = vector.shape_cast %147 : vector<2x8x8xf32> to vector<16x8xf32>
    %149 = vector.extract_strided_slice %6 {offsets = [0, 16], sizes = [16, 8], strides = [1, 1]} : vector<16x32xf32> to vector<16x8xf32>
    %cst_44 = arith.constant dense<0.000000e+00> : vector<16xf32>
    %150 = vector.multi_reduction <add>, %149, %cst_44 [1] : vector<16x8xf32> to vector<16xf32>
    %151 = vector.shape_cast %150 : vector<16xf32> to vector<16x1xf32>
    %cst_45 = arith.constant 8.000000e+00 : f32
    %152 = vector.broadcast %cst_45 : f32 to vector<16x1xf32>
    %153 = arith.divf %151, %152 : vector<16x1xf32>
    %154 = vector.broadcast %153 : vector<16x1xf32> to vector<16x8xf32>
    %155 = arith.subf %149, %154 : vector<16x8xf32>
    %156 = arith.mulf %155, %155 : vector<16x8xf32>
    %cst_46 = arith.constant dense<0.000000e+00> : vector<16xf32>
    %157 = vector.multi_reduction <add>, %156, %cst_46 [1] : vector<16x8xf32> to vector<16xf32>
    %158 = vector.shape_cast %157 : vector<16xf32> to vector<16x1xf32>
    %cst_47 = arith.constant 8.000000e+00 : f32
    %159 = vector.broadcast %cst_47 : f32 to vector<16x1xf32>
    %160 = arith.divf %158, %159 : vector<16x1xf32>
    %161 = vector.broadcast %153 : vector<16x1xf32> to vector<16x8xf32>
    %162 = arith.subf %149, %161 : vector<16x8xf32>
    %cst_48 = arith.constant 9.99999997E-7 : f32
    %163 = vector.broadcast %cst_48 : f32 to vector<16x1xf32>
    %164 = arith.addf %160, %163 : vector<16x1xf32>
    %165 = math.rsqrt %164 : vector<16x1xf32>
    %166 = vector.broadcast %165 : vector<16x1xf32> to vector<16x8xf32>
    %167 = arith.mulf %162, %166 : vector<16x8xf32>
    %168 = vector.broadcast %15 : vector<1x8xf32> to vector<16x8xf32>
    %169 = arith.mulf %167, %168 : vector<16x8xf32>
    %170 = vector.broadcast %16 : vector<1x8xf32> to vector<16x8xf32>
    %171 = arith.addf %169, %170 : vector<16x8xf32>
    %172 = vector.shape_cast %171 : vector<16x8xf32> to vector<2x8x8xf32>
    %173 = vector.extract_strided_slice %12 {offsets = [0, 16], sizes = [32, 8], strides = [1, 1]} : vector<32x32xf32> to vector<32x8xf32>
    %cst_49 = arith.constant dense<0.000000e+00> : vector<32xf32>
    %174 = vector.multi_reduction <add>, %173, %cst_49 [1] : vector<32x8xf32> to vector<32xf32>
    %175 = vector.shape_cast %174 : vector<32xf32> to vector<32x1xf32>
    %cst_50 = arith.constant 8.000000e+00 : f32
    %176 = vector.broadcast %cst_50 : f32 to vector<32x1xf32>
    %177 = arith.divf %175, %176 : vector<32x1xf32>
    %178 = vector.broadcast %177 : vector<32x1xf32> to vector<32x8xf32>
    %179 = arith.subf %173, %178 : vector<32x8xf32>
    %180 = arith.mulf %179, %179 : vector<32x8xf32>
    %cst_51 = arith.constant dense<0.000000e+00> : vector<32xf32>
    %181 = vector.multi_reduction <add>, %180, %cst_51 [1] : vector<32x8xf32> to vector<32xf32>
    %182 = vector.shape_cast %181 : vector<32xf32> to vector<32x1xf32>
    %cst_52 = arith.constant 8.000000e+00 : f32
    %183 = vector.broadcast %cst_52 : f32 to vector<32x1xf32>
    %184 = arith.divf %182, %183 : vector<32x1xf32>
    %185 = vector.broadcast %177 : vector<32x1xf32> to vector<32x8xf32>
    %186 = arith.subf %173, %185 : vector<32x8xf32>
    %cst_53 = arith.constant 9.99999997E-7 : f32
    %187 = vector.broadcast %cst_53 : f32 to vector<32x1xf32>
    %188 = arith.addf %184, %187 : vector<32x1xf32>
    %189 = math.rsqrt %188 : vector<32x1xf32>
    %190 = vector.broadcast %189 : vector<32x1xf32> to vector<32x8xf32>
    %191 = arith.mulf %186, %190 : vector<32x8xf32>
    %192 = vector.broadcast %17 : vector<1x8xf32> to vector<32x8xf32>
    %193 = arith.mulf %191, %192 : vector<32x8xf32>
    %194 = vector.broadcast %18 : vector<1x8xf32> to vector<32x8xf32>
    %195 = arith.addf %193, %194 : vector<32x8xf32>
    %196 = vector.shape_cast %195 : vector<32x8xf32> to vector<2x16x8xf32>
    %197 = vector.extract_strided_slice %13 {offsets = [0, 16], sizes = [32, 8], strides = [1, 1]} : vector<32x32xf32> to vector<32x8xf32>
    %198 = vector.shape_cast %197 : vector<32x8xf32> to vector<2x16x8xf32>
    "tpu.trace_start"() <{level = 10 : i32, message = "bqd,bkd->bqk"}> : () -> ()
    %cst_54 = arith.constant dense<0.000000e+00> : vector<2x8x16xf32>
    %199 = tpu.matmul %172, %196, %cst_54 {dimension_numbers = #tpu.dot_dimension_numbers<[2], [2], [1], [1], [0, 0, 0, 1, 1, 1], [0], [0]>} : vector<2x8x8xf32>, vector<2x16x8xf32>, vector<2x8x16xf32> -> vector<2x8x16xf32>
    "tpu.trace_stop"() : () -> ()
    %cst_55 = arith.constant 0.353553385 : f32
    %200 = vector.broadcast %cst_55 : f32 to vector<2x8x16xf32>
    %201 = arith.mulf %199, %200 : vector<2x8x16xf32>
    %cst_56 = arith.constant dense<0xFF800000> : vector<2x8xf32>
    %202 = vector.multi_reduction <maximumf>, %201, %cst_56 [2] : vector<2x8x16xf32> to vector<2x8xf32>
    %203 = vector.shape_cast %202 : vector<2x8xf32> to vector<2x8x1xf32>
    %204 = vector.broadcast %203 : vector<2x8x1xf32> to vector<2x8x16xf32>
    %205 = arith.subf %201, %204 : vector<2x8x16xf32>
    %206 = math.exp %205 : vector<2x8x16xf32>
    %cst_57 = arith.constant dense<0.000000e+00> : vector<2x8xf32>
    %207 = vector.multi_reduction <add>, %206, %cst_57 [2] : vector<2x8x16xf32> to vector<2x8xf32>
    %208 = vector.shape_cast %207 : vector<2x8xf32> to vector<2x8x1xf32>
    %209 = tpu.reciprocal %208 : vector<2x8x1xf32> -> vector<2x8x1xf32>
    %210 = vector.broadcast %209 : vector<2x8x1xf32> to vector<2x8x16xf32>
    %211 = arith.mulf %206, %210 : vector<2x8x16xf32>
    "tpu.trace_start"() <{level = 10 : i32, message = "bqk,bkd->bqd"}> : () -> ()
    %cst_58 = arith.constant dense<0.000000e+00> : vector<2x8x8xf32>
    %212 = tpu.matmul %211, %198, %cst_58 {dimension_numbers = #tpu.dot_dimension_numbers<[2], [1], [1], [2], [0, 0, 0, 1, 1, 2], [0], [0]>} : vector<2x8x16xf32>, vector<2x16x8xf32>, vector<2x8x8xf32> -> vector<2x8x8xf32>
    "tpu.trace_stop"() : () -> ()
    %213 = vector.shape_cast %212 : vector<2x8x8xf32> to vector<16x8xf32>
    %214 = vector.extract_strided_slice %6 {offsets = [0, 24], sizes = [16, 8], strides = [1, 1]} : vector<16x32xf32> to vector<16x8xf32>
    %cst_59 = arith.constant dense<0.000000e+00> : vector<16xf32>
    %215 = vector.multi_reduction <add>, %214, %cst_59 [1] : vector<16x8xf32> to vector<16xf32>
    %216 = vector.shape_cast %215 : vector<16xf32> to vector<16x1xf32>
    %cst_60 = arith.constant 8.000000e+00 : f32
    %217 = vector.broadcast %cst_60 : f32 to vector<16x1xf32>
    %218 = arith.divf %216, %217 : vector<16x1xf32>
    %219 = vector.broadcast %218 : vector<16x1xf32> to vector<16x8xf32>
    %220 = arith.subf %214, %219 : vector<16x8xf32>
    %221 = arith.mulf %220, %220 : vector<16x8xf32>
    %cst_61 = arith.constant dense<0.000000e+00> : vector<16xf32>
    %222 = vector.multi_reduction <add>, %221, %cst_61 [1] : vector<16x8xf32> to vector<16xf32>
    %223 = vector.shape_cast %222 : vector<16xf32> to vector<16x1xf32>
    %cst_62 = arith.constant 8.000000e+00 : f32
    %224 = vector.broadcast %cst_62 : f32 to vector<16x1xf32>
    %225 = arith.divf %223, %224 : vector<16x1xf32>
    %226 = vector.broadcast %218 : vector<16x1xf32> to vector<16x8xf32>
    %227 = arith.subf %214, %226 : vector<16x8xf32>
    %cst_63 = arith.constant 9.99999997E-7 : f32
    %228 = vector.broadcast %cst_63 : f32 to vector<16x1xf32>
    %229 = arith.addf %225, %228 : vector<16x1xf32>
    %230 = math.rsqrt %229 : vector<16x1xf32>
    %231 = vector.broadcast %230 : vector<16x1xf32> to vector<16x8xf32>
    %232 = arith.mulf %227, %231 : vector<16x8xf32>
    %233 = vector.broadcast %15 : vector<1x8xf32> to vector<16x8xf32>
    %234 = arith.mulf %232, %233 : vector<16x8xf32>
    %235 = vector.broadcast %16 : vector<1x8xf32> to vector<16x8xf32>
    %236 = arith.addf %234, %235 : vector<16x8xf32>
    %237 = vector.shape_cast %236 : vector<16x8xf32> to vector<2x8x8xf32>
    %238 = vector.extract_strided_slice %12 {offsets = [0, 24], sizes = [32, 8], strides = [1, 1]} : vector<32x32xf32> to vector<32x8xf32>
    %cst_64 = arith.constant dense<0.000000e+00> : vector<32xf32>
    %239 = vector.multi_reduction <add>, %238, %cst_64 [1] : vector<32x8xf32> to vector<32xf32>
    %240 = vector.shape_cast %239 : vector<32xf32> to vector<32x1xf32>
    %cst_65 = arith.constant 8.000000e+00 : f32
    %241 = vector.broadcast %cst_65 : f32 to vector<32x1xf32>
    %242 = arith.divf %240, %241 : vector<32x1xf32>
    %243 = vector.broadcast %242 : vector<32x1xf32> to vector<32x8xf32>
    %244 = arith.subf %238, %243 : vector<32x8xf32>
    %245 = arith.mulf %244, %244 : vector<32x8xf32>
    %cst_66 = arith.constant dense<0.000000e+00> : vector<32xf32>
    %246 = vector.multi_reduction <add>, %245, %cst_66 [1] : vector<32x8xf32> to vector<32xf32>
    %247 = vector.shape_cast %246 : vector<32xf32> to vector<32x1xf32>
    %cst_67 = arith.constant 8.000000e+00 : f32
    %248 = vector.broadcast %cst_67 : f32 to vector<32x1xf32>
    %249 = arith.divf %247, %248 : vector<32x1xf32>
    %250 = vector.broadcast %242 : vector<32x1xf32> to vector<32x8xf32>
    %251 = arith.subf %238, %250 : vector<32x8xf32>
    %cst_68 = arith.constant 9.99999997E-7 : f32
    %252 = vector.broadcast %cst_68 : f32 to vector<32x1xf32>
    %253 = arith.addf %249, %252 : vector<32x1xf32>
    %254 = math.rsqrt %253 : vector<32x1xf32>
    %255 = vector.broadcast %254 : vector<32x1xf32> to vector<32x8xf32>
    %256 = arith.mulf %251, %255 : vector<32x8xf32>
    %257 = vector.broadcast %17 : vector<1x8xf32> to vector<32x8xf32>
    %258 = arith.mulf %256, %257 : vector<32x8xf32>
    %259 = vector.broadcast %18 : vector<1x8xf32> to vector<32x8xf32>
    %260 = arith.addf %258, %259 : vector<32x8xf32>
    %261 = vector.shape_cast %260 : vector<32x8xf32> to vector<2x16x8xf32>
    %262 = vector.extract_strided_slice %13 {offsets = [0, 24], sizes = [32, 8], strides = [1, 1]} : vector<32x32xf32> to vector<32x8xf32>
    %263 = vector.shape_cast %262 : vector<32x8xf32> to vector<2x16x8xf32>
    "tpu.trace_start"() <{level = 10 : i32, message = "bqd,bkd->bqk"}> : () -> ()
    %cst_69 = arith.constant dense<0.000000e+00> : vector<2x8x16xf32>
    %264 = tpu.matmul %237, %261, %cst_69 {dimension_numbers = #tpu.dot_dimension_numbers<[2], [2], [1], [1], [0, 0, 0, 1, 1, 1], [0], [0]>} : vector<2x8x8xf32>, vector<2x16x8xf32>, vector<2x8x16xf32> -> vector<2x8x16xf32>
    "tpu.trace_stop"() : () -> ()
    %cst_70 = arith.constant 0.353553385 : f32
    %265 = vector.broadcast %cst_70 : f32 to vector<2x8x16xf32>
    %266 = arith.mulf %264, %265 : vector<2x8x16xf32>
    %cst_71 = arith.constant dense<0xFF800000> : vector<2x8xf32>
    %267 = vector.multi_reduction <maximumf>, %266, %cst_71 [2] : vector<2x8x16xf32> to vector<2x8xf32>
    %268 = vector.shape_cast %267 : vector<2x8xf32> to vector<2x8x1xf32>
    %269 = vector.broadcast %268 : vector<2x8x1xf32> to vector<2x8x16xf32>
    %270 = arith.subf %266, %269 : vector<2x8x16xf32>
    %271 = math.exp %270 : vector<2x8x16xf32>
    %cst_72 = arith.constant dense<0.000000e+00> : vector<2x8xf32>
    %272 = vector.multi_reduction <add>, %271, %cst_72 [2] : vector<2x8x16xf32> to vector<2x8xf32>
    %273 = vector.shape_cast %272 : vector<2x8xf32> to vector<2x8x1xf32>
    %274 = tpu.reciprocal %273 : vector<2x8x1xf32> -> vector<2x8x1xf32>
    %275 = vector.broadcast %274 : vector<2x8x1xf32> to vector<2x8x16xf32>
    %276 = arith.mulf %271, %275 : vector<2x8x16xf32>
    "tpu.trace_start"() <{level = 10 : i32, message = "bqk,bkd->bqd"}> : () -> ()
    %cst_73 = arith.constant dense<0.000000e+00> : vector<2x8x8xf32>
    %277 = tpu.matmul %276, %263, %cst_73 {dimension_numbers = #tpu.dot_dimension_numbers<[2], [1], [1], [2], [0, 0, 0, 1, 1, 2], [0], [0]>} : vector<2x8x16xf32>, vector<2x16x8xf32>, vector<2x8x8xf32> -> vector<2x8x8xf32>
    "tpu.trace_stop"() : () -> ()
    %278 = vector.shape_cast %277 : vector<2x8x8xf32> to vector<16x8xf32>
    %279 = tpu.concatenate %83, %148, %213, %278 in 1 : vector<16x8xf32>, vector<16x8xf32>, vector<16x8xf32>, vector<16x8xf32> -> vector<16x32xf32>
    %c0_74 = arith.constant 0 : index
    %c0_75 = arith.constant 0 : index
    %280 = vector.load %arg7[%c0_74, %c0_75] : memref<32x32xf32, #tpu.memory_space<vmem>>, vector<32x32xf32>
    %cst_76 = arith.constant dense<0.000000e+00> : vector<16x32xf32>
    %281 = tpu.matmul %279, %280, %cst_76 {dimension_numbers = #tpu.dot_dimension_numbers<[1], [0], [0], [1], [0, 0, 1, 1], [], []>} : vector<16x32xf32>, vector<32x32xf32>, vector<16x32xf32> -> vector<16x32xf32>
    %c0_77 = arith.constant 0 : index
    %c0_78 = arith.constant 0 : index
    %282 = vector.load %arg8[%c0_77, %c0_78] : memref<1x32xf32, #tpu.memory_space<vmem>>, vector<1x32xf32>
    %283 = vector.broadcast %282 : vector<1x32xf32> to vector<16x32xf32>
    %284 = arith.addf %281, %283 : vector<16x32xf32>
    %c0_79 = arith.constant 0 : index
    %c0_80 = arith.constant 0 : index
    %285 = vector.load %arg10[%c0_79, %c0_80] : memref<16x32xf32, #tpu.memory_space<vmem>>, vector<16x32xf32>
    tpu.vector_store %arg10[%c0_79, %c0_80], %284 {strides = array<i32>} : memref<16x32xf32, #tpu.memory_space<vmem>>, vector<16x32xf32>,
    return
  }
  func.func @transform_0(%arg0: i32) -> (i32, i32) {
    %c0_i32 = arith.constant 0 : i32
    %c0_i32_0 = arith.constant 0 : i32
    %c0_i32_1 = arith.constant 0 : i32
    return %c0_i32, %c0_i32_0 : i32, i32
  }
  func.func @transform_1(%arg0: i32) -> (i32, i32) {
    %c0_i32 = arith.constant 0 : i32
    %c0_i32_0 = arith.constant 0 : i32
    %c0_i32_1 = arith.constant 0 : i32
    return %c0_i32, %c0_i32_0 : i32, i32
  }
  func.func @transform_2(%arg0: i32) -> (i32, i32) {
    %c0_i32 = arith.constant 0 : i32
    %c0_i32_0 = arith.constant 0 : i32
    %c0_i32_1 = arith.constant 0 : i32
    return %c0_i32, %c0_i32_0 : i32, i32
  }
  func.func @transform_3(%arg0: i32) -> (i32, i32) {
    %c0_i32 = arith.constant 0 : i32
    %c0_i32_0 = arith.constant 0 : i32
    %c0_i32_1 = arith.constant 0 : i32
    return %c0_i32, %c0_i32_0 : i32, i32
  }
  func.func @transform_4(%arg0: i32) -> (i32, i32) {
    %c0_i32 = arith.constant 0 : i32
    %c0_i32_0 = arith.constant 0 : i32
    %c0_i32_1 = arith.constant 0 : i32
    return %c0_i32, %c0_i32_0 : i32, i32
  }
  func.func @transform_5(%arg0: i32) -> (i32, i32) {
    %c0_i32 = arith.constant 0 : i32
    %c0_i32_0 = arith.constant 0 : i32
    %c0_i32_1 = arith.constant 0 : i32
    return %c0_i32, %c0_i32_0 : i32, i32
  }
  func.func @transform_6(%arg0: i32) -> (i32, i32) {
    %c0_i32 = arith.constant 0 : i32
    %c0_i32_0 = arith.constant 0 : i32
    %c0_i32_1 = arith.constant 0 : i32
    return %c0_i32, %c0_i32_0 : i32, i32
  }
  func.func @transform_7(%arg0: i32) -> (i32, i32) {
    %c0_i32 = arith.constant 0 : i32
    %c0_i32_0 = arith.constant 0 : i32
    %c0_i32_1 = arith.constant 0 : i32
    return %c0_i32, %c0_i32_0 : i32, i32
  }
  func.func @transform_8(%arg0: i32) -> (i32, i32) {
    %c0_i32 = arith.constant 0 : i32
    %c0_i32_0 = arith.constant 0 : i32
    %c0_i32_1 = arith.constant 0 : i32
    return %c0_i32, %c0_i32_0 : i32, i32
  }
  func.func @transform_9(%arg0: i32) -> (i32, i32) {
    %c0_i32 = arith.constant 0 : i32
    %c0_i32_0 = arith.constant 0 : i32
    %c0_i32_1 = arith.constant 0 : i32
    return %c0_i32, %c0_i32_0 : i32, i32
  }
}

</mosaic_0001>

<bundles_post_ra>
// kernel: tpu_custom_call.1
= control target key start
LH: loop header
LB: loop body
LE: loop exit
PB: predicated region body
PF: predicated region fallthrough
CT: control target
= control target key end

     0   :  { %14 = vsyncpa [#allocation3], 0  ;;  %s3513_s0 = inlined_call_operand.hbm [shape: f32[16,32], index: 0, kind: input, shape index: {}]   ;;  %s3514_s1 = inlined_call_operand.hbm [shape: f32[32,32], index: 1, kind: input, shape index: {}]   ;;  %s3515_s2 = inlined_call_operand.hbm [shape: f32[32,32], index: 2, kind: input, shape index: {}]   ;;  %s3516_s3 = inlined_call_operand.vmem [shape: f32[1,32], index: 3, kind: input, shape index: {}]   ;;  %s3517_s4 = inlined_call_operand.hbm [shape: f32[32,64], index: 4, kind: input, shape index: {}]   ;;  %s3518_s5 = inlined_call_operand.vmem [shape: f32[1,64], index: 5, kind: input, shape index: {}]   ;;  %s3519_s6 = inlined_call_operand.hbm [shape: f32[32,32], index: 6, kind: input, shape index: {}]   ;;  %s3520_s7 = inlined_call_operand.vmem [shape: f32[1,32], index: 7, kind: input, shape index: {}]   ;;  %s3521_s8 = inlined_call_operand.vmem [shape: f32[4,8], index: 8, kind: input, shape index: {}]   ;;  %s3522_s9 = inlined_call_operand.hbm [shape: f32[16,32], index: 9, kind: output, shape index: {}]  }
   0x1   :  { %15 = vsyncpa [#allocation6], 0 }
   0x2   :  { %16 = vsyncpa [#allocation9], 0 }
   0x3   :  { %17 = vsyncpa [#allocation4], 0  ;;  %s2886_s30 = smov [#allocation5]   ;;  %s2887_s11 = smov [#allocation8]  }
   0x4   :  { %s35_s10 = sshll.u32 %s2886_s30, 4  ;;  %s61_s12 = sshll.u32 %s2887_s11, 4  ;;  %s36_s10 = int_to_ptr.vmem [resolvable:$true] %s35_s10  ;;  %s62_s12 = int_to_ptr.vmem [resolvable:$true] %s61_s12 }
   0x5   :  { %s2766_s13 = scalar_lea.vmem %s36_s10, 512  ;;  %p2771_p1 = scmp.lt.s32.totalorder %s36_s10, %s36_s10 }
   0x6   :  { %p2767_p0 = scmp.ne.s32.totalorder %s36_s10, %s2766_s13  ;;  %p2772_p2 = scmp.lt.s32.totalorder %s2766_s13, %s2766_s13 }
   0x8   :  { %p2773_p3 = por %p2772_p2, %p2771_p1 }
   0xa   :  { %p2774_p4 = pnand %p2773_p3, %p2767_p0 }
   0xc   :  { %2777 = shalt.err (!%p2774_p4)
}
   0xd   :  { %s2888_s14 = smov 128   ;;  %s2889_s15 = smov 8  }
   0xe   :  { %41 = dma.hbm_to_vmem [thread:$0]  %s3514_s1, 512, %s36_s10, [#allocation6], %s2888_s14, %s2888_s14, %s2889_s15  }
   0xf   :  { %s2786_s18 = scalar_lea.vmem %s62_s12, 512  ;;  %p2791_p6 = scmp.lt.s32.totalorder %s62_s12, %s62_s12 }
  0x10   :  { %p2787_p5 = scmp.ne.s32.totalorder %s62_s12, %s2786_s18  ;;  %p2792_p7 = scmp.lt.s32.totalorder %s2786_s18, %s2786_s18 }
  0x12   :  { %p2793_p8 = por %p2792_p7, %p2791_p6 }
  0x14   :  { %p2794_p9 = pnand %p2793_p8, %p2787_p5 }
  0x16   :  { %2797 = shalt.err (!%p2794_p9)
}
  0x17   :  { %67 = dma.hbm_to_vmem [thread:$0]  %s3517_s4, 512, %s62_s12, [#allocation9], %s2888_s14, %s2888_s14, %s2889_s15  }
  0x18   :  { %s2890_s21 = smov [#allocation2]   ;;  %s2891_s23 = smov [#allocation7]  }
  0x19   :  { %s23_s22 = sshll.u32 %s2890_s21, 4  ;;  %s47_s24 = sshll.u32 %s2891_s23, 4  ;;  %s24_s22 = int_to_ptr.vmem [resolvable:$true] %s23_s22  ;;  %s48_s24 = int_to_ptr.vmem [resolvable:$true] %s47_s24 }
  0x1a   :  { %s2806_s1 = scalar_lea.vmem %s24_s22, 256  ;;  %p2811_p11 = scmp.lt.s32.totalorder %s24_s22, %s24_s22 }
  0x1b   :  { %p2807_p10 = scmp.ne.s32.totalorder %s24_s22, %s2806_s1  ;;  %p2812_p12 = scmp.lt.s32.totalorder %s2806_s1, %s2806_s1 }
  0x1d   :  { %p2813_p13 = por %p2812_p12, %p2811_p11 }
  0x1f   :  { %p2814_p0 = pnand %p2813_p13, %p2807_p10 }
  0x21   :  { %2817 = shalt.err (!%p2814_p0)
}
  0x22   :  { %29 = dma.hbm_to_vmem [thread:$0]  %s3513_s0, 256, %s24_s22, [#allocation3], %s2888_s14, %s2888_s14, %s2889_s15  }
  0x23   :  { %s2826_s4 = scalar_lea.vmem %s48_s24, 512  ;;  %p2831_p2 = scmp.lt.s32.totalorder %s48_s24, %s48_s24 }
  0x24   :  { %p2827_p1 = scmp.ne.s32.totalorder %s48_s24, %s2826_s4  ;;  %p2832_p3 = scmp.lt.s32.totalorder %s2826_s4, %s2826_s4 }
  0x26   :  { %p2833_p4 = por %p2832_p3, %p2831_p2 }
  0x28   :  { %p2834_p5 = pnand %p2833_p4, %p2827_p1 }
  0x2a   :  { %2837 = shalt.err (!%p2834_p5)
}
  0x2b   :  { %53 = dma.hbm_to_vmem [thread:$0]  %s3515_s2, 512, %s48_s24, [#allocation6], %s2888_s14, %s2888_s14, %s2889_s15  }
  0x2c   :  { %s2892_s29 = smov [#allocation10]  }
  0x2d   :  { %s75_s30 = sshll.u32 %s2892_s29, 4  ;;  %s76_s30 = int_to_ptr.vmem [resolvable:$true] %s75_s30 }
  0x2e   :  { %s2846_s10 = scalar_lea.vmem %s76_s30, 512  ;;  %p2851_p7 = scmp.lt.s32.totalorder %s76_s30, %s76_s30 }
  0x2f   :  { %p2847_p6 = scmp.ne.s32.totalorder %s76_s30, %s2846_s10  ;;  %p2852_p8 = scmp.lt.s32.totalorder %s2846_s10, %s2846_s10 }
  0x31   :  { %p2853_p9 = por %p2852_p8, %p2851_p7 }
  0x33   :  { %p2854_p10 = pnand %p2853_p9, %p2847_p6 }
  0x35   :  { %2857 = shalt.err (!%p2854_p10)
}
  0x36   :  { %81 = dma.hbm_to_vmem [thread:$0]  %s3519_s6, 512, %s76_s30, [#allocation9], %s2888_s14, %s2888_s14, %s2889_s15  }
  0x37   :  { %2878 = dma.done.wait [#allocation3], 256  }
  0x38   :  { %2879 = vsyncadd [#allocation3], 4294967040 }
  0x39   :  { %2880 = dma.done.wait [#allocation6], 1024  }
  0x3a   :  { %2881 = vsyncadd [#allocation6], 4294966272 }
  0x3b   :  { %2882 = dma.done.wait [#allocation9], 1024  }
  0x3c   :  { %2883 = vsyncadd [#allocation9], 4294966272  ;;  %v203_v0 = vld [vmem:[#allocation8 + $0x18] sm:$0xff]  ;;  %v202_v1 = vld [vmem:[#allocation8 + $0x10] sm:$0xff]  ;;  %vm118_vm0 = vcmask 261120   ;;  %vm309_vm1 = vcmask 64512  }
  0x3d   :  { %v110_v2 = vld [vmem:[#allocation7 + $0x18] sm:$0xff]  ;;  %2522 = vmatprep.subr.mxu1 %v203_v0  ;;  %v109_v3 = vld [vmem:[#allocation7 + $0x10] sm:$0xff]  ;;  %v201_v4 = vld [vmem:[#allocation8 + $0x8] sm:$0xff]  ;;  %vm2895_vm2 = vmmov 0   ;;  %vm577_vm3 = vcmask 130048   ;;  %s2897_s17 = smov 112  }
  0x3e   :  { %2511 = vmatprep.subr.mxu0 %v110_v2  ;;  %2523 = vmatpush3.msra.mxu1 %v203_v0  ;;  %v103_v5 = vld [vmem:[#allocation5] sm:$0xff]  ;;  %v108_v6 = vld [vmem:[#allocation7 + $0x8] sm:$0xff]  ;;  %v101_v10 = vld [vmem:[#allocation2] sm:$0xff]  ;;  %v2894_v0 = vmov 0.0   ;;  %s2898_s18 = smov 16   ;;  %s2899_s19 = smov 88  }
  0x3f   :  { %2512 = vmatpush3.msra.mxu0 %v110_v2  ;;  %2524 = vmatprep.subr.mxu1 %v202_v1  ;;  %v200_v7 = vld [vmem:[#allocation8] sm:$0xff]  ;;  %v104_v9 = vld [vmem:[#allocation5 + $0x8] sm:$0xff]  ;;  %v105_v11 = vld [vmem:[#allocation5 + $0x10] sm:$0xff]  ;;  %s2900_s20 = smov 104   ;;  %s2901_s21 = smov 24   ;;  %vm2284_vm4 = vcmask 195584  }
  0x40   :  { %2513 = vmatprep.subr.mxu0 %v109_v3  ;;  %2525 = vmatpush3.msra.mxu1 %v202_v1  ;;  %v107_v8 = vld [vmem:[#allocation7] sm:$0xff]  ;;  %v102_v12 = vld [vmem:[#allocation2 + $0x8] sm:$0xff]  ;;  %v2403_v14 = vld [vmem:[%s3518_s5] ss:$0 sm:$0xff]  ;;  %s2902_s22 = smov 80   ;;  %s2903_s23 = smov 72  }
  0x41   :  { %2514 = vmatpush3.msra.mxu0 %v109_v3  ;;  %2526 = vmatprep.subr.mxu1 %v201_v4  ;;  %v106_v13 = vld [vmem:[#allocation5 + $0x18] sm:$0xff]  ;;  %v2400_v21 = vld [vmem:[%s3516_s3] ss:$0 sm:$0xff]  ;;  %s2893_s3 = smov 120   ;;  %s2904_s25 = smov [#allocation11]  }
  0x42   :  { %2530 = vmatprep.mubr.msk.f32.mxu1 %vm118_vm0, %v103_v5  ;;  %2527 = vmatpush3.msra.mxu1 %v201_v4  ;;  %s2386_s26 = sshll.u32 %s2904_s25, 4  ;;  %s2387_s26 = int_to_ptr.vmem [resolvable:$true] %s2386_s26 }
  0x43   :  { %2515 = vmatprep.subr.mxu0 %v108_v6  ;;  %2528 = vmatprep.subr.mxu1 %v200_v7  ;;  %s2858_s4 = scalar_lea.vmem %s2387_s26, 256  ;;  %p2863_p12 = scmp.lt.s32.totalorder %s2387_s26, %s2387_s26 }
  0x44   :  { %2516 = vmatpush3.msra.mxu0 %v108_v6  ;;  %2529 = vmatpush3.msra.mxu1 %v200_v7  ;;  %p2859_p11 = scmp.ne.s32.totalorder %s2387_s26, %s2858_s4  ;;  %p2864_p13 = scmp.lt.s32.totalorder %s2858_s4, %s2858_s4 }
  0x45   :  { %2517 = vmatprep.subr.mxu0 %v107_v8  ;;  %2531 = vmatmul.mubr.msk.f32.vlgmr.msra.gmra.mxu1 %vm118_vm0, %v104_v9 }
  0x46   :  { %2518 = vmatpush3.msra.mxu0 %v107_v8  ;;  %2519 = vmatprep.mubr.msk.f32.mxu0 %vm118_vm0, %v101_v10  ;;  %v337_v8 = vlaneseq  ;;  %p2865_p0 = por %p2864_p13, %p2863_p12 }
  0x47   :  { %2533 = vmatprep.mubr.msk.f32.mxu1 %vm118_vm0, %v105_v11  ;;  %2520 = vmatmul.mubr.msk.f32.vlgmr.msra.gmra.mxu0 %vm118_vm0, %v102_v12 }
  0x48   :  { %2536 = vmatprep.subr.mxu0 %v2894_v0  ;;  %2543 = vmatprep.subr.mxu1 %v2894_v0  ;;  %p2866_p1 = pnand %p2865_p0, %p2859_p11 }
  0x49   :  { %2534 = vmatmul.mubr.msk.f32.gmra.mxu1 %vm118_vm0, %v106_v13  ;;  %2540 = vmatprep.mubr.msk.f32.mxu0 %vm2895_vm2, %v2894_v0 }
  0x4a   :  { %2547 = vmatprep.mubr.msk.f32.mxu1 %vm2895_vm2, %v2894_v0 }
 0x105   :  { %v2532_v15 = vpop.f32.mrf.mxu1 }
 0x106   :  { %v2994_v16 = vadd.f32 %v2532_v15, %v2403_v14  ;;  %v338_v15 = vshrl.u32 %v337_v8, 7 }
 0x107   :  { %v289_v17 = vpop.f32.mrf.mxu1  ;;  %v2521_v18 = vpop.f32.mrf.mxu0 }
 0x108   :  { %v2996_v19 = vadd.f32 %v2403_v14, %v289_v17  ;;  %v352_v20 = vsel %vm309_vm1, %v2994_v16, 0.0  ;;  %v3013_v30 = vadd.f32 %v2521_v18, %v2400_v21 }
 0x109   :  { %353 = vadd.xlane.f32.xlu0 %v352_v20  ;;  %v2535_v22 = vpop.f32.mrf.mxu1  ;;  %v191_v23 = vpop.f32.mrf.mxu0 }
 0x10a   :  { %v3003_v24 = vadd.f32 %v2535_v22, %v2403_v14  ;;  %v3005_v26 = vadd.f32 %v2400_v21, %v191_v23  ;;  %v349_v29 = vsel %vm309_vm1, %v2996_v19, 0.0  ;;  %v313_v33 = vsel %vm309_vm1, %v3013_v30, 0.0 }
 0x10b   :  { %v299_v25 = vpop.f32.mrf.mxu1 }
 0x10c   :  { %v3007_v27 = vadd.f32 %v2403_v14, %v299_v25  ;;  %v358_v28 = vsel %vm309_vm1, %v3003_v24, 0.0  ;;  %v310_v32 = vsel %vm309_vm1, %v3005_v26, 0.0  ;;  %v403_v25 = vsub.s32 2, %v338_v15 }
 0x10d   :  { %359 = vadd.xlane.f32.xlu1 %v358_v28  ;;  %350 = vadd.xlane.f32.xlu0 %v349_v29  ;;  %v308_v28 = vld [vmem:[%s3521_s8] sm:$0xf]  ;;  %s2896_s8 = smov 96  }
 0x10e   :  { %v355_v31 = vsel %vm309_vm1, %v3007_v27, 0.0 }
 0x111   :  { %356 = vadd.xlane.f32.xlu0 %v355_v31  ;;  %311 = vadd.xlane.f32.xlu1 %v310_v32  ;;  %v411_v31 = vsub.s32 3, %v338_v15 }
 0x115   :  { %314 = vadd.xlane.f32.xlu1 %v313_v33 }
 0x192   :  { %v354_v34 = vpop.xlane.xlu0 %353 }
 0x193   :  { %v362_v35 = vmul.f32 0.125, %v354_v34  ;;  %v3080_v34 = vrot.slane %v308_v28, %v403_v25 }
 0x195   :  { %v3022_v36 = vsub.f32 %v2994_v16, %v362_v35 }
 0x196   :  { %v360_v37 = vpop.xlane.xlu1 %359  ;;  %v351_v38 = vpop.xlane.xlu0 %350 }
 0x197   :  { %v364_v39 = vmul.f32 0.125, %v360_v37  ;;  %v361_v40 = vmul.f32 0.125, %v351_v38  ;;  %v370_v41 = vmul.f32 %v3022_v36, %v3022_v36  ;;  %v3083_v38 = vrot.slane %v308_v28, %v411_v31 }
 0x199   :  { %v3027_v42 = vsub.f32 %v3003_v24, %v364_v39  ;;  %v3030_v43 = vsub.f32 %v2996_v19, %v361_v40  ;;  %v376_v44 = vsel %vm309_vm1, %v370_v41, 0.0 }
 0x19a   :  { %377 = vadd.xlane.f32.xlu0 %v376_v44  ;;  %v357_v45 = vpop.xlane.xlu0 %356  ;;  %v312_v46 = vpop.xlane.xlu1 %311 }
 0x19b   :  { %v363_v47 = vmul.f32 0.125, %v357_v45  ;;  %v317_v48 = vmul.f32 0.125, %v312_v46  ;;  %v372_v49 = vmul.f32 %v3027_v42, %v3027_v42  ;;  %v369_v50 = vmul.f32 %v3030_v43, %v3030_v43 }
 0x19c   :  { %v339_v45 = vsub.s32 0, %v338_v15 }
 0x19d   :  { %v3038_v51 = vsub.f32 %v3007_v27, %v363_v47  ;;  %v3041_v52 = vsub.f32 %v3005_v26, %v317_v48  ;;  %v382_v53 = vsel %vm309_vm1, %v372_v49, 0.0  ;;  %v373_v54 = vsel %vm309_vm1, %v369_v50, 0.0 }
 0x19e   :  { %383 = vadd.xlane.f32.xlu0 %v382_v53  ;;  %374 = vadd.xlane.f32.xlu1 %v373_v54  ;;  %v315_v55 = vpop.xlane.xlu1 %314  ;;  %v345_v53 = vsub.s32 1, %v338_v15 }
 0x19f   :  { %v318_v56 = vmul.f32 0.125, %v315_v55  ;;  %v371_v57 = vmul.f32 %v3038_v51, %v3038_v51  ;;  %v321_v58 = vmul.f32 %v3041_v52, %v3041_v52 }
 0x1a1   :  { %v3050_v59 = vsub.f32 %v3013_v30, %v318_v56  ;;  %v379_v60 = vsel %vm309_vm1, %v371_v57, 0.0  ;;  %v323_v61 = vsel %vm309_vm1, %v321_v58, 0.0  ;;  %v3093_v56 = vrot.slane %v308_v28, %v339_v45 }
 0x1a2   :  { %380 = vadd.xlane.f32.xlu0 %v379_v60  ;;  %324 = vadd.xlane.f32.xlu1 %v323_v61 }
 0x1a3   :  { %v322_v62 = vmul.f32 %v3050_v59, %v3050_v59 }
 0x1a5   :  { %v326_v63 = vsel %vm309_vm1, %v322_v62, 0.0 }
 0x1a6   :  { %327 = vadd.xlane.f32.xlu1 %v326_v63 }
 0x1b7   :  { %822 = vrot.lane.b32.xlu1 %v3003_v24, %s2893_s3 }
 0x1b8   :  { %818 = vrot.lane.b32.xlu0 %v2994_v16, %s2893_s3 }
 0x1bb   :  { %816 = vrot.lane.b32.xlu1 %v2996_v19, %s2893_s3 }
 0x1bc   :  { %764 = vrot.lane.b32.xlu0 %v3005_v26, %s2893_s3 }
 0x1bf   :  { %820 = vrot.lane.b32.xlu1 %v3007_v27, %s2893_s3 }
 0x1c3   :  { %766 = vrot.lane.b32.xlu1 %v3013_v30, %s2893_s3 }
 0x223   :  { %v378_v1 = vpop.xlane.xlu0 %377 }
 0x224   :  { %v386_v2 = vmul.f32 0.125, %v378_v1  ;;  %v3101_v1 = vrot.slane %v308_v28, %v345_v53 }
 0x226   :  { %v390_v3 = vadd.f32 1e-06, %v386_v2 }
 0x227   :  { %v384_v4 = vpop.xlane.xlu0 %383  ;;  %v375_v5 = vpop.xlane.xlu1 %374 }
 0x228   :  { %2678 = vrsqrt.f32 %v390_v3  ;;  %v388_v6 = vmul.f32 0.125, %v384_v4  ;;  %v385_v7 = vmul.f32 0.125, %v375_v5 }
 0x22a   :  { %v392_v9 = vadd.f32 1e-06, %v388_v6  ;;  %v389_v10 = vadd.f32 1e-06, %v385_v7 }
 0x22b   :  { %v381_v11 = vpop.xlane.xlu0 %380  ;;  %v325_v12 = vpop.xlane.xlu1 %324 }
 0x22c   :  { %2680 = vrsqrt.f32 %v392_v9  ;;  %v387_v13 = vmul.f32 0.125, %v381_v11  ;;  %v329_v14 = vmul.f32 0.125, %v325_v12 }
 0x22d   :  { %2682 = vrsqrt.f32 %v389_v10 }
 0x22e   :  { %v391_v17 = vadd.f32 1e-06, %v387_v13  ;;  %v331_v18 = vadd.f32 1e-06, %v329_v14 }
 0x22f   :  { %v819_v20 = vpop.permute.xlu0 %818  ;;  %v328_v21 = vpop.xlane.xlu1 %327 }
 0x230   :  { %2684 = vrsqrt.f32 %v391_v17  ;;  %v330_v22 = vmul.f32 0.125, %v328_v21  ;;  %v831_v23 = vsel %vm309_vm1, %v819_v20, 0.0 }
 0x231   :  { %2686 = vrsqrt.f32 %v331_v18  ;;  %832 = vadd.xlane.f32.xlu0 %v831_v23 }
 0x232   :  { %v332_v29 = vadd.f32 1e-06, %v330_v22 }
 0x233   :  { %v823_v32 = vpop.permute.xlu1 %822  ;;  %v765_v57 = vpop.permute.xlu0 %764 }
 0x234   :  { %2688 = vrsqrt.f32 %v332_v29  ;;  %v837_v33 = vsel %vm309_vm1, %v823_v32, 0.0  ;;  %v770_v2 = vsel %vm309_vm1, %v765_v57, 0.0 }
 0x235   :  { %v2679_v35 = vpop.eup %2678  ;;  %838 = vadd.xlane.f32.xlu1 %v837_v33 }
 0x236   :  { %v398_v37 = vmul.f32 %v2679_v35, %v3022_v36 }
 0x237   :  { %v817_v39 = vpop.permute.xlu1 %816 }
 0x238   :  { %v828_v40 = vsel %vm309_vm1, %v817_v39, 0.0  ;;  %v406_v41 = vmul.f32 %v3080_v34, %v398_v37 }
 0x239   :  { %v2681_v44 = vpop.eup %2680  ;;  %829 = vadd.xlane.f32.xlu0 %v828_v40 }
 0x23a   :  { %v2683_v46 = vpop.eup %2682  ;;  %v414_v47 = vadd.f32 %v3083_v38, %v406_v41  ;;  %v400_v48 = vmul.f32 %v2681_v44, %v3027_v42 }
 0x23b   :  { %v821_v49 = vpop.permute.xlu1 %820  ;;  %v397_v50 = vmul.f32 %v2683_v46, %v3030_v43 }
 0x23c   :  { %2537 = vmatpush3.xpose.msk.msra.mxu0 %vm309_vm1, %v414_v47  ;;  %v834_v36 = vsel %vm309_vm1, %v821_v49, 0.0  ;;  %v408_v54 = vmul.f32 %v3080_v34, %v400_v48 }
 0x23d   :  { %v2685_v55 = vpop.eup %2684  ;;  %835 = vadd.xlane.f32.xlu0 %v834_v36  ;;  %2538 = vmatprep.subr.mxu0 %v2894_v0  ;;  %v405_v58 = vmul.f32 %v3080_v34, %v397_v50 }
 0x23e   :  { %v2687_v42 = vpop.eup %2686  ;;  %v416_v60 = vadd.f32 %v3083_v38, %v408_v54  ;;  %v399_v43 = vmul.f32 %v2685_v55, %v3038_v51 }
 0x23f   :  { %v767_v61 = vpop.permute.xlu1 %766  ;;  %v413_v62 = vadd.f32 %v3083_v38, %v405_v58  ;;  %v335_v63 = vmul.f32 %v2687_v42, %v3041_v52 }
 0x240   :  { %2544 = vmatpush3.xpose.msk.msra.mxu1 %vm309_vm1, %v416_v60  ;;  %v773_v3 = vsel %vm309_vm1, %v767_v61, 0.0  ;;  %v407_v4 = vmul.f32 %v3080_v34, %v399_v43 }
 0x241   :  { %v2689_v5 = vpop.eup %2688  ;;  %2539 = vmatpush3.xpose.msk.msra.mxu0 %vm309_vm1, %v413_v62  ;;  %771 = vadd.xlane.f32.xlu0 %v770_v2  ;;  %v341_v51 = vmul.f32 %v3093_v56, %v335_v63 }
 0x242   :  { %v336_v6 = vmul.f32 %v2689_v5, %v3050_v59  ;;  %774 = vadd.xlane.f32.xlu1 %v773_v3  ;;  %2545 = vmatprep.subr.mxu1 %v2894_v0  ;;  %v415_v52 = vadd.f32 %v3083_v38, %v407_v4 }
 0x243   :  { %v347_v7 = vadd.f32 %v3101_v1, %v341_v51  ;;  %2564 = vmatprep.subr.mxu0 %v2894_v0 }
 0x244   :  { %v342_v8 = vmul.f32 %v3093_v56, %v336_v6  ;;  %2546 = vmatpush3.xpose.msk.msra.mxu1 %vm309_vm1, %v415_v52 }
 0x245   :  { %2541 = vmatmul.mubr.msk.f32.vlgmr.msra.gmra.mxu0 %vm309_vm1, %v347_v7  ;;  %2550 = vmatprep.subr.mxu1 %v2894_v0 }
 0x246   :  { %v348_v9 = vadd.f32 %v3101_v1, %v342_v8  ;;  %2568 = vmatprep.mubr.msk.f32.mxu0 %vm2895_vm2, %v2894_v0 }
 0x248   :  { %2548 = vmatmul.mubr.msk.f32.vlgmr.msra.gmra.mxu1 %vm309_vm1, %v348_v9 }
 0x249   :  { %2554 = vmatprep.mubr.msk.f32.mxu1 %vm2895_vm2, %v2894_v0 }
 0x2ba   :  { %v833_v59 = vpop.xlane.xlu0 %832 }
 0x2bb   :  { %v841_v10 = vmul.f32 0.125, %v833_v59 }
 0x2bd   :  { %v3125_v11 = vsub.f32 %v2994_v16, %v841_v10 }
 0x2be   :  { %v839_v13 = vpop.xlane.xlu1 %838 }
 0x2bf   :  { %v849_v12 = vmul.f32 %v3125_v11, %v3125_v11  ;;  %v843_v15 = vmul.f32 0.125, %v839_v13 }
 0x2c1   :  { %858 = vrot.lane.b32.xlu0 %v849_v12, %s2893_s3  ;;  %v3134_v21 = vsub.f32 %v3003_v24, %v843_v15 }
 0x2c2   :  { %v830_v14 = vpop.xlane.xlu0 %829 }
 0x2c3   :  { %v840_v17 = vmul.f32 0.125, %v830_v14  ;;  %v851_v32 = vmul.f32 %v3134_v21, %v3134_v21 }
 0x2c5   :  { %v3131_v18 = vsub.f32 %v2996_v19, %v840_v17 }
 0x2c6   :  { %v836_v20 = vpop.xlane.xlu0 %835 }
 0x2c7   :  { %v842_v22 = vmul.f32 0.125, %v836_v20  ;;  %v848_v23 = vmul.f32 %v3131_v18, %v3131_v18 }
 0x2c9   :  { %856 = vrot.lane.b32.xlu1 %v848_v23, %s2893_s3  ;;  %v3140_v28 = vsub.f32 %v3007_v27, %v842_v22 }
 0x2ca   :  { %v772_v25 = vpop.xlane.xlu0 %771 }
 0x2cb   :  { %v776_v29 = vmul.f32 0.125, %v772_v25  ;;  %v775_v31 = vpop.xlane.xlu1 %774  ;;  %v850_v40 = vmul.f32 %v3140_v28, %v3140_v28 }
 0x2cc   :  { %v777_v33 = vmul.f32 0.125, %v775_v31 }
 0x2cd   :  { %v3145_v35 = vsub.f32 %v3005_v26, %v776_v29  ;;  %862 = vrot.lane.b32.xlu1 %v851_v32, %s2893_s3 }
 0x2ce   :  { %v3149_v37 = vsub.f32 %v3013_v30, %v777_v33 }
 0x2cf   :  { %v780_v39 = vmul.f32 %v3145_v35, %v3145_v35 }
 0x2d0   :  { %v781_v41 = vmul.f32 %v3149_v37, %v3149_v37 }
 0x2d1   :  { %784 = vrot.lane.b32.xlu0 %v780_v39, %s2893_s3  ;;  %860 = vrot.lane.b32.xlu1 %v850_v40, %s2893_s3 }
 0x2d5   :  { %786 = vrot.lane.b32.xlu1 %v781_v41, %s2893_s3 }
 0x305   :  { %v492_v44 = vpop.f32.mrf.mxu0 }
 0x306   :  { %v575_v45 = vmul.f32 0.35355338, %v492_v44 }
 0x307   :  { %v2542_v46 = vpop.f32.mrf.mxu0 }
 0x308   :  { %v571_v47 = vpop.f32.mrf.mxu1  ;;  %v578_v48 = vsel %vm577_vm3, %v575_v45, -inf }
 0x309   :  { %v3161_v49 = vmul.f32 0.35355338, %v571_v47  ;;  %579 = vmax.xlane.f32.xlu0 %v578_v48 }
 0x30a   :  { %v2549_v50 = vpop.f32.mrf.mxu1 }
 0x30b   :  { %v581_v53 = vsel %vm577_vm3, %v3161_v49, -inf }
 0x30c   :  { %582 = vmax.xlane.f32.xlu1 %v581_v53 }
 0x333   :  { %v859_v36 = vpop.permute.xlu0 %858 }
 0x334   :  { %v871_v54 = vsel %vm309_vm1, %v859_v36, 0.0 }
 0x335   :  { %872 = vadd.xlane.f32.xlu0 %v871_v54 }
 0x33b   :  { %v857_v55 = vpop.permute.xlu1 %856 }
 0x33c   :  { %v868_v60 = vsel %vm309_vm1, %v857_v55, 0.0 }
 0x33f   :  { %v863_v57 = vpop.permute.xlu1 %862 }
 0x340   :  { %v877_v58 = vsel %vm309_vm1, %v863_v57, 0.0 }
 0x341   :  { %878 = vadd.xlane.f32.xlu0 %v877_v58 }
 0x343   :  { %v861_v42 = vpop.permute.xlu1 %860  ;;  %v785_v61 = vpop.permute.xlu0 %784 }
 0x344   :  { %v874_v43 = vsel %vm309_vm1, %v861_v42, 0.0  ;;  %v790_v63 = vsel %vm309_vm1, %v785_v61, 0.0 }
 0x345   :  { %869 = vadd.xlane.f32.xlu0 %v868_v60  ;;  %875 = vadd.xlane.f32.xlu1 %v874_v43 }
 0x347   :  { %v787_v62 = vpop.permute.xlu1 %786 }
 0x348   :  { %v793_v2 = vsel %vm309_vm1, %v787_v62, 0.0 }
 0x349   :  { %791 = vadd.xlane.f32.xlu0 %v790_v63  ;;  %794 = vadd.xlane.f32.xlu1 %v793_v2 }
 0x35a   :  { %905 = vrot.lane.b32.xlu1 %v3083_v38, %s2889_s15 }
 0x35e   :  { %805 = vrot.lane.b32.xlu1 %v3093_v56, %s2889_s15 }
 0x35f   :  { %897 = vrot.lane.b32.xlu0 %v3080_v34, %s2889_s15 }
 0x362   :  { %811 = vrot.lane.b32.xlu1 %v3101_v1, %s2889_s15 }
 0x363   :  { %604 = vrot.lane.b32.xlu0 %v2994_v16, %s2896_s8 }
 0x366   :  { %602 = vrot.lane.b32.xlu1 %v2996_v19, %s2896_s8 }
 0x367   :  { %685 = vrot.lane.b32.xlu0 %v3003_v24, %s2896_s8 }
 0x36a   :  { %683 = vrot.lane.b32.xlu1 %v3007_v27, %s2896_s8 }
 0x392   :  { %v580_v3 = vpop.xlane.xlu0 %579 }
 0x393   :  { %v584_v4 = vsub.f32 %v575_v45, %v580_v3 }
 0x395   :  { %v586_v5 = vmul.f32 1.442695, %v584_v4  ;;  %v583_v9 = vpop.xlane.xlu1 %582 }
 0x397   :  { %2690 = vpow2.f32 %v586_v5 }
 0x3a4   :  { %v3183_v51 = vpop.eup %2690 }
 0x3a5   :  { %v590_v6 = vsel %vm577_vm3, %v3183_v51, 0.0 }
 0x3a6   :  { %591 = vadd.xlane.f32.xlu0 %v590_v6 }
 0x3be   :  { %v873_v52 = vpop.xlane.xlu0 %872 }
 0x3bf   :  { %v881_v7 = vmul.f32 0.125, %v873_v52 }
 0x3c1   :  { %v885_v8 = vadd.f32 1e-06, %v881_v7 }
 0x3c3   :  { %2692 = vrsqrt.f32 %v885_v8 }
 0x3ca   :  { %v879_v59 = vpop.xlane.xlu0 %878 }
 0x3cb   :  { %v883_v10 = vmul.f32 0.125, %v879_v59 }
 0x3cd   :  { %v887_v12 = vadd.f32 1e-06, %v883_v10 }
 0x3ce   :  { %v870_v13 = vpop.xlane.xlu0 %869  ;;  %v876_v14 = vpop.xlane.xlu1 %875 }
 0x3cf   :  { %2694 = vrsqrt.f32 %v887_v12  ;;  %v880_v15 = vmul.f32 0.125, %v870_v13  ;;  %v882_v17 = vmul.f32 0.125, %v876_v14 }
 0x3d0   :  { %v2693_v23 = vpop.eup %2692 }
 0x3d1   :  { %v884_v20 = vadd.f32 1e-06, %v880_v15  ;;  %v886_v22 = vadd.f32 1e-06, %v882_v17  ;;  %v893_v33 = vmul.f32 %v2693_v23, %v3125_v11 }
 0x3d2   :  { %v792_v25 = vpop.xlane.xlu0 %791  ;;  %v795_v29 = vpop.xlane.xlu1 %794 }
 0x3d3   :  { %2696 = vrsqrt.f32 %v884_v20  ;;  %v796_v31 = vmul.f32 0.125, %v792_v25  ;;  %v797_v2 = vmul.f32 0.125, %v795_v29 }
 0x3d4   :  { %2698 = vrsqrt.f32 %v886_v22 }
 0x3d5   :  { %v798_v32 = vadd.f32 1e-06, %v796_v31  ;;  %v799_v3 = vadd.f32 1e-06, %v797_v2 }
 0x3d6   :  { %v898_v39 = vpop.permute.xlu0 %897  ;;  %v906_v40 = vpop.permute.xlu1 %905 }
 0x3d7   :  { %2700 = vrsqrt.f32 %v798_v32  ;;  %v901_v41 = vmul.f32 %v898_v39, %v893_v33 }
 0x3d9   :  { %v909_v44 = vadd.f32 %v906_v40, %v901_v41 }
 0x3da   :  { %v605_v45 = vpop.permute.xlu0 %604  ;;  %v806_v46 = vpop.permute.xlu1 %805 }
 0x3db   :  { %2551 = vmatpush3.msra.mxu1 %v605_v45  ;;  %919 = vrot.lane.b32.xlu0 %v909_v44, %s2893_s3 }
 0x3dc   :  { %v2695_v47 = vpop.eup %2694  ;;  %2552 = vmatprep.subr.mxu1 %v2894_v0 }
 0x3dd   :  { %v895_v48 = vmul.f32 %v2695_v47, %v3134_v21 }
 0x3de   :  { %v812_v50 = vpop.permute.xlu1 %811  ;;  %v686_v8 = vpop.permute.xlu0 %685 }
 0x3df   :  { %v903_v53 = vmul.f32 %v898_v39, %v895_v48 }
 0x3e0   :  { %v2697_v36 = vpop.eup %2696 }
 0x3e1   :  { %v2699_v54 = vpop.eup %2698  ;;  %v911_v11 = vadd.f32 %v906_v40, %v903_v53  ;;  %v892_v55 = vmul.f32 %v2697_v36, %v3131_v18 }
 0x3e2   :  { %v603_v57 = vpop.permute.xlu1 %602  ;;  %v894_v58 = vmul.f32 %v2699_v54, %v3140_v28  ;;  %v585_v28 = vsub.f32 %v3161_v49, %v583_v9 }
 0x3e3   :  { %1004 = vrot.lane.b32.xlu1 %v911_v11, %s2893_s3  ;;  %2553 = vmatpush3.msra.mxu1 %v603_v57  ;;  %v900_v42 = vmul.f32 %v898_v39, %v892_v55 }
 0x3e4   :  { %v2701_v60 = vpop.eup %2700  ;;  %v902_v43 = vmul.f32 %v898_v39, %v894_v58  ;;  %2557 = vmatprep.subr.mxu1 %v2894_v0 }
 0x3e5   :  { %v802_v21 = vmul.f32 %v2701_v60, %v3145_v35  ;;  %v908_v61 = vadd.f32 %v906_v40, %v900_v42  ;;  %v588_v35 = vmul.f32 1.442695, %v585_v28 }
 0x3e6   :  { %v910_v62 = vadd.f32 %v906_v40, %v902_v43 }
 0x3e7   :  { %v808_v63 = vmul.f32 %v806_v46, %v802_v21  ;;  %917 = vrot.lane.b32.xlu0 %v908_v61, %s2893_s3  ;;  %2702 = vpow2.f32 %v588_v35 }
 0x3e8   :  { %1002 = vrot.lane.b32.xlu1 %v910_v62, %s2893_s3  ;;  %2704 = vrsqrt.f32 %v799_v3 }
 0x3e9   :  { %v814_v18 = vadd.f32 %v812_v50, %v808_v63 }
 0x3eb   :  { %913 = vrot.lane.b32.xlu0 %v814_v18, %s2893_s3 }
 0x3ef   :  { %1316 = vrot.lane.b32.xlu0 %v2994_v16, %s2897_s17 }
 0x3f3   :  { %1314 = vrot.lane.b32.xlu0 %v2996_v19, %s2897_s17 }
 0x3f4   :  { %v2703_v4 = vpop.eup %2702 }
 0x3f5   :  { %v593_v5 = vsel %vm577_vm3, %v2703_v4, 0.0  ;;  %v2705_v6 = vpop.eup %2704 }
 0x3f6   :  { %v803_v52 = vmul.f32 %v2705_v6, %v3149_v37  ;;  %v684_v37 = vpop.permute.xlu1 %683 }
 0x3f7   :  { %1264 = vrot.lane.b32.xlu0 %v3005_v26, %s2897_s17 }
 0x3f8   :  { %v809_v7 = vmul.f32 %v806_v46, %v803_v52 }
 0x3fa   :  { %v815_v49 = vadd.f32 %v812_v50, %v809_v7 }
 0x40c   :  { %594 = vadd.xlane.f32.xlu1 %v593_v5 }
 0x41d   :  { %998 = vrot.lane.b32.xlu1 %v815_v49, %s2893_s3 }
 0x421   :  { %1320 = vrot.lane.b32.xlu1 %v3003_v24, %s2897_s17 }
 0x425   :  { %1318 = vrot.lane.b32.xlu1 %v3007_v27, %s2897_s17 }
 0x429   :  { %1266 = vrot.lane.b32.xlu1 %v3013_v30, %s2897_s17 }
 0x42f   :  { %v592_v9 = vpop.xlane.xlu0 %591 }
 0x430   :  { %2706 = vrcp.f32 %v592_v9 }
 0x43d   :  { %v2707_v59 = vpop.eup %2706 }
 0x43e   :  { %v598_v10 = vmul.f32 %v2707_v59, %v3183_v51 }
 0x440   :  { %2555 = vmatmul.mubr.msk.f32.vlgmr.msra.gmra.mxu1 %vm577_vm3, %v598_v10 }
 0x441   :  { %2558 = vmatpush3.msra.mxu1 %v686_v8  ;;  %2561 = vmatprep.mubr.msk.f32.mxu1 %vm2895_vm2, %v2894_v0 }
 0x442   :  { %2559 = vmatprep.subr.mxu1 %v2894_v0 }
 0x443   :  { %2560 = vmatpush3.msra.mxu1 %v684_v37 }
 0x444   :  { %2571 = vmatprep.subr.mxu1 %v2894_v0 }
 0x44d   :  { %v920_v12 = vpop.permute.xlu0 %919 }
 0x44e   :  { %2565 = vmatpush3.xpose.msk.msra.mxu0 %vm309_vm1, %v920_v12 }
 0x44f   :  { %2566 = vmatprep.subr.mxu0 %v2894_v0 }
 0x455   :  { %v1005_v22 = vpop.permute.xlu1 %1004 }
 0x459   :  { %v918_v13 = vpop.permute.xlu0 %917 }
 0x45a   :  { %2567 = vmatpush3.xpose.msk.msra.mxu0 %vm309_vm1, %v918_v13  ;;  %v1003_v23 = vpop.permute.xlu1 %1002 }
 0x45b   :  { %2578 = vmatprep.subr.mxu0 %v2894_v0 }
 0x45d   :  { %v914_v51 = vpop.permute.xlu0 %913 }
 0x45e   :  { %2569 = vmatmul.mubr.msk.f32.vlgmr.msra.gmra.mxu0 %vm309_vm1, %v914_v51 }
 0x45f   :  { %2582 = vmatprep.mubr.msk.f32.mxu0 %vm2895_vm2, %v2894_v0 }
 0x461   :  { %v1317_v14 = vpop.permute.xlu0 %1316 }
 0x462   :  { %v1329_v15 = vsel %vm309_vm1, %v1317_v14, 0.0 }
 0x463   :  { %1330 = vadd.xlane.f32.xlu0 %v1329_v15 }
 0x465   :  { %v1315_v17 = vpop.permute.xlu0 %1314 }
 0x466   :  { %v1326_v20 = vsel %vm309_vm1, %v1315_v17, 0.0 }
 0x467   :  { %1327 = vadd.xlane.f32.xlu0 %v1326_v20 }
 0x469   :  { %v1265_v41 = vpop.permute.xlu0 %1264 }
 0x46a   :  { %v1270_v46 = vsel %vm309_vm1, %v1265_v41, 0.0 }
 0x495   :  { %v595_v25 = vpop.xlane.xlu1 %594 }
 0x496   :  { %2708 = vrcp.f32 %v595_v25 }
 0x499   :  { %v999_v29 = vpop.permute.xlu1 %998 }
 0x49d   :  { %v1321_v31 = vpop.permute.xlu1 %1320 }
 0x49e   :  { %v1335_v32 = vsel %vm309_vm1, %v1321_v31, 0.0 }
 0x49f   :  { %1336 = vadd.xlane.f32.xlu1 %v1335_v32 }
 0x4a1   :  { %v1319_v33 = vpop.permute.xlu1 %1318 }
 0x4a2   :  { %v1332_v39 = vsel %vm309_vm1, %v1319_v33, 0.0 }
 0x4a3   :  { %v2709_v40 = vpop.eup %2708  ;;  %1333 = vadd.xlane.f32.xlu0 %v1332_v39 }
 0x4a4   :  { %v599_v44 = vmul.f32 %v2709_v40, %v2703_v4 }
 0x4a5   :  { %v1267_v45 = vpop.permute.xlu1 %1266 }
 0x4a6   :  { %2562 = vmatmul.mubr.msk.f32.vlgmr.msra.gmra.mxu1 %vm577_vm3, %v599_v44  ;;  %v1273_v47 = vsel %vm309_vm1, %v1267_v45, 0.0 }
 0x4a7   :  { %2572 = vmatpush3.xpose.msk.msra.mxu1 %vm309_vm1, %v1005_v22  ;;  %1271 = vadd.xlane.f32.xlu0 %v1270_v46 }
 0x4a8   :  { %1274 = vadd.xlane.f32.xlu1 %v1273_v47  ;;  %2573 = vmatprep.subr.mxu1 %v2894_v0 }
 0x4a9   :  { %2575 = vmatprep.mubr.msk.f32.mxu1 %vm2895_vm2, %v2894_v0 }
 0x4ab   :  { %2574 = vmatpush3.xpose.msk.msra.mxu1 %vm309_vm1, %v1003_v23 }
 0x4ac   :  { %2585 = vmatprep.subr.mxu1 %v2894_v0 }
 0x4ae   :  { %2576 = vmatmul.mubr.msk.f32.vlgmr.msra.gmra.mxu1 %vm309_vm1, %v999_v29 }
 0x4af   :  { %2589 = vmatprep.mubr.msk.f32.mxu1 %vm2895_vm2, %v2894_v0 }
 0x4ec   :  { %v1331_v48 = vpop.xlane.xlu0 %1330 }
 0x4ed   :  { %v1339_v50 = vmul.f32 0.125, %v1331_v48 }
 0x4ef   :  { %v3245_v53 = vsub.f32 %v2994_v16, %v1339_v50 }
 0x4f0   :  { %v1328_v58 = vpop.xlane.xlu0 %1327 }
 0x4f1   :  { %v1347_v36 = vmul.f32 %v3245_v53, %v3245_v53  ;;  %v1338_v60 = vmul.f32 0.125, %v1328_v58 }
 0x4f3   :  { %1356 = vrot.lane.b32.xlu0 %v1347_v36, %s2897_s17  ;;  %v3256_v62 = vsub.f32 %v2996_v19, %v1338_v60 }
 0x4f5   :  { %v1346_v4 = vmul.f32 %v3256_v62, %v3256_v62 }
 0x500   :  { %v3250_v54 = vpop.f32.mrf.mxu1 }
 0x502   :  { %v2556_v11 = vpop.f32.mrf.mxu1 }
 0x51e   :  { %v993_v55 = vpop.f32.mrf.mxu0 }
 0x51f   :  { %v1082_v9 = vmul.f32 0.35355338, %v993_v55 }
 0x520   :  { %v2570_v57 = vpop.f32.mrf.mxu0 }
 0x521   :  { %v1084_v59 = vsel %vm577_vm3, %v1082_v9, -inf }
 0x528   :  { %v1337_v42 = vpop.xlane.xlu1 %1336 }
 0x529   :  { %v1341_v43 = vmul.f32 0.125, %v1337_v42 }
 0x52b   :  { %v3253_v21 = vsub.f32 %v3003_v24, %v1341_v43 }
 0x52c   :  { %v1334_v61 = vpop.xlane.xlu0 %1333 }
 0x52d   :  { %v1340_v63 = vmul.f32 0.125, %v1334_v61  ;;  %v1349_v18 = vmul.f32 %v3253_v21, %v3253_v21 }
 0x52f   :  { %1360 = vrot.lane.b32.xlu1 %v1349_v18, %s2897_s17  ;;  %v3262_v35 = vsub.f32 %v3007_v27, %v1340_v63 }
 0x530   :  { %v1272_v28 = vpop.xlane.xlu0 %1271 }
 0x531   :  { %v1276_v2 = vmul.f32 0.125, %v1272_v28  ;;  %v1275_v3 = vpop.xlane.xlu1 %1274  ;;  %v1348_v49 = vmul.f32 %v3262_v35, %v3262_v35 }
 0x532   :  { %v1277_v5 = vmul.f32 0.125, %v1275_v3 }
 0x533   :  { %v3267_v6 = vsub.f32 %v3005_v26, %v1276_v2  ;;  %1354 = vrot.lane.b32.xlu1 %v1346_v4, %s2897_s17 }
 0x534   :  { %v3271_v52 = vsub.f32 %v3013_v30, %v1277_v5 }
 0x535   :  { %v1280_v7 = vmul.f32 %v3267_v6, %v3267_v6 }
 0x536   :  { %v1281_v8 = vmul.f32 %v3271_v52, %v3271_v52 }
 0x537   :  { %1284 = vrot.lane.b32.xlu0 %v1280_v7, %s2897_s17  ;;  %1358 = vrot.lane.b32.xlu1 %v1348_v49, %s2897_s17 }
 0x53b   :  { %1286 = vrot.lane.b32.xlu1 %v1281_v8, %s2897_s17 }
 0x556   :  { %1085 = vmax.xlane.f32.xlu0 %v1084_v59 }
 0x565   :  { %v1357_v10 = vpop.permute.xlu0 %1356 }
 0x566   :  { %v3283_v37 = vpop.f32.mrf.mxu1  ;;  %v1369_v12 = vsel %vm309_vm1, %v1357_v10, 0.0 }
 0x567   :  { %1370 = vadd.xlane.f32.xlu0 %v1369_v12 }
 0x568   :  { %v2563_v13 = vpop.f32.mrf.mxu1 }
 0x56e   :  { %v1078_v51 = vpop.f32.mrf.mxu1 }
 0x56f   :  { %v3286_v14 = vmul.f32 0.35355338, %v1078_v51 }
 0x570   :  { %v2577_v15 = vpop.f32.mrf.mxu1 }
 0x571   :  { %v1087_v17 = vsel %vm577_vm3, %v3286_v14, -inf }
 0x572   :  { %1088 = vmax.xlane.f32.xlu1 %v1087_v17 }
 0x5a1   :  { %v1361_v20 = vpop.permute.xlu1 %1360 }
 0x5a2   :  { %v1375_v22 = vsel %vm309_vm1, %v1361_v20, 0.0 }
 0x5a3   :  { %1376 = vadd.xlane.f32.xlu0 %v1375_v22 }
 0x5a5   :  { %v1355_v23 = vpop.permute.xlu1 %1354 }
 0x5a6   :  { %v1366_v25 = vsel %vm309_vm1, %v1355_v23, 0.0 }
 0x5a7   :  { %1367 = vadd.xlane.f32.xlu0 %v1366_v25 }
 0x5a9   :  { %v1285_v29 = vpop.permute.xlu0 %1284  ;;  %v1359_v31 = vpop.permute.xlu1 %1358 }
 0x5aa   :  { %v1290_v32 = vsel %vm309_vm1, %v1285_v29, 0.0  ;;  %v1372_v33 = vsel %vm309_vm1, %v1359_v31, 0.0 }
 0x5ab   :  { %1291 = vadd.xlane.f32.xlu0 %v1290_v32  ;;  %1373 = vadd.xlane.f32.xlu1 %v1372_v33 }
 0x5ad   :  { %v1287_v39 = vpop.permute.xlu1 %1286 }
 0x5ae   :  { %v1293_v40 = vsel %vm309_vm1, %v1287_v39, 0.0 }
 0x5af   :  { %1294 = vadd.xlane.f32.xlu1 %v1293_v40 }
 0x5c0   :  { %1401 = vrot.lane.b32.xlu1 %v3083_v38, %s2898_s18 }
 0x5c1   :  { %1394 = vrot.lane.b32.xlu0 %v3080_v34, %s2898_s18 }
 0x5c4   :  { %1304 = vrot.lane.b32.xlu1 %v3093_v56, %s2898_s18 }
 0x5c8   :  { %1309 = vrot.lane.b32.xlu1 %v3101_v1, %s2898_s18 }
 0x5cc   :  { %1187 = vrot.lane.b32.xlu1 %v3003_v24, %s2899_s19 }
 0x5d0   :  { %1185 = vrot.lane.b32.xlu1 %v3007_v27, %s2899_s19 }
 0x5df   :  { %v1086_v41 = vpop.xlane.xlu0 %1085 }
 0x5e0   :  { %v1090_v44 = vsub.f32 %v1082_v9, %v1086_v41 }
 0x5e2   :  { %v1092_v45 = vmul.f32 1.442695, %v1090_v44 }
 0x5e4   :  { %2710 = vpow2.f32 %v1092_v45 }
 0x5f0   :  { %v1371_v48 = vpop.xlane.xlu0 %1370 }
 0x5f1   :  { %v3305_v46 = vpop.eup %2710  ;;  %v1379_v50 = vmul.f32 0.125, %v1371_v48 }
 0x5f2   :  { %v1096_v47 = vsel %vm577_vm3, %v3305_v46, 0.0 }
 0x5f3   :  { %1097 = vadd.xlane.f32.xlu0 %v1096_v47  ;;  %v1383_v36 = vadd.f32 1e-06, %v1379_v50 }
 0x5f5   :  { %2712 = vrsqrt.f32 %v1383_v36 }
 0x5fb   :  { %v1089_v58 = vpop.xlane.xlu1 %1088 }
 0x602   :  { %v2713_v2 = vpop.eup %2712 }
 0x603   :  { %v1391_v49 = vmul.f32 %v2713_v2, %v3245_v53 }
 0x609   :  { %1108 = vrot.lane.b32.xlu0 %v2994_v16, %s2899_s19 }
 0x60d   :  { %1106 = vrot.lane.b32.xlu0 %v2996_v19, %s2899_s19 }
 0x62c   :  { %v1377_v11 = vpop.xlane.xlu0 %1376 }
 0x62d   :  { %v1381_v55 = vmul.f32 0.125, %v1377_v11 }
 0x62f   :  { %v1385_v57 = vadd.f32 1e-06, %v1381_v55 }
 0x630   :  { %v1368_v42 = vpop.xlane.xlu0 %1367 }
 0x631   :  { %2714 = vrsqrt.f32 %v1385_v57  ;;  %v1378_v60 = vmul.f32 0.125, %v1368_v42 }
 0x633   :  { %v1382_v43 = vadd.f32 1e-06, %v1378_v60 }
 0x634   :  { %v1292_v61 = vpop.xlane.xlu0 %1291  ;;  %v1374_v63 = vpop.xlane.xlu1 %1373 }
 0x635   :  { %2716 = vrsqrt.f32 %v1382_v43  ;;  %v1296_v18 = vmul.f32 0.125, %v1292_v61  ;;  %v1380_v28 = vmul.f32 0.125, %v1374_v63 }
 0x637   :  { %v1298_v3 = vadd.f32 1e-06, %v1296_v18  ;;  %v1384_v4 = vadd.f32 1e-06, %v1380_v28 }
 0x638   :  { %v1395_v5 = vpop.permute.xlu0 %1394  ;;  %v1295_v7 = vpop.xlane.xlu1 %1294 }
 0x639   :  { %2718 = vrsqrt.f32 %v1298_v3  ;;  %v1398_v8 = vmul.f32 %v1395_v5, %v1391_v49  ;;  %v1297_v44 = vmul.f32 0.125, %v1295_v7 }
 0x63a   :  { %2720 = vrsqrt.f32 %v1384_v4 }
 0x63b   :  { %v1299_v45 = vadd.f32 1e-06, %v1297_v44 }
 0x63c   :  { %v1402_v9 = vpop.permute.xlu1 %1401 }
 0x63d   :  { %v1405_v59 = vadd.f32 %v1402_v9, %v1398_v8 }
 0x63e   :  { %v2715_v10 = vpop.eup %2714 }
 0x63f   :  { %v1393_v12 = vmul.f32 %v2715_v10, %v3253_v21  ;;  %1415 = vrot.lane.b32.xlu0 %v1405_v59, %s2897_s17 }
 0x640   :  { %v1305_v13 = vpop.permute.xlu1 %1304 }
 0x641   :  { %v1400_v51 = vmul.f32 %v1395_v5, %v1393_v12 }
 0x642   :  { %v2717_v15 = vpop.eup %2716 }
 0x643   :  { %v1390_v17 = vmul.f32 %v2717_v15, %v3256_v62  ;;  %v1407_v20 = vadd.f32 %v1402_v9, %v1400_v51 }
 0x644   :  { %v1310_v22 = vpop.permute.xlu1 %1309 }
 0x645   :  { %v1397_v23 = vmul.f32 %v1395_v5, %v1390_v17  ;;  %1500 = vrot.lane.b32.xlu1 %v1407_v20, %s2897_s17 }
 0x646   :  { %v2719_v53 = vpop.eup %2718 }
 0x647   :  { %v2721_v25 = vpop.eup %2720  ;;  %v1302_v29 = vmul.f32 %v2719_v53, %v3267_v6  ;;  %v1404_v31 = vadd.f32 %v1402_v9, %v1397_v23 }
 0x648   :  { %v1392_v32 = vmul.f32 %v2721_v25, %v3262_v35  ;;  %v1188_v21 = vpop.permute.xlu1 %1187  ;;  %v1091_v35 = vsub.f32 %v3286_v14, %v1089_v58 }
 0x649   :  { %v1307_v33 = vmul.f32 %v1305_v13, %v1302_v29  ;;  %1413 = vrot.lane.b32.xlu0 %v1404_v31, %s2897_s17  ;;  %2586 = vmatpush3.msra.mxu1 %v1188_v21 }
 0x64a   :  { %v1399_v39 = vmul.f32 %v1395_v5, %v1392_v32  ;;  %2587 = vmatprep.subr.mxu1 %v2894_v0  ;;  %v1094_v6 = vmul.f32 1.442695, %v1091_v35 }
 0x64b   :  { %v1312_v62 = vadd.f32 %v1310_v22, %v1307_v33 }
 0x64c   :  { %v1186_v40 = vpop.permute.xlu1 %1185  ;;  %v1406_v41 = vadd.f32 %v1402_v9, %v1399_v39  ;;  %2722 = vpow2.f32 %v1094_v6 }
 0x64d   :  { %1409 = vrot.lane.b32.xlu0 %v1312_v62, %s2897_s17  ;;  %2588 = vmatpush3.msra.mxu1 %v1186_v40  ;;  %2724 = vrsqrt.f32 %v1299_v45 }
 0x64e   :  { %1498 = vrot.lane.b32.xlu1 %v1406_v41, %s2897_s17  ;;  %2599 = vmatprep.subr.mxu1 %v2894_v0 }
 0x651   :  { %1812 = vrot.lane.b32.xlu0 %v2994_v16, %s2900_s20 }
 0x655   :  { %1810 = vrot.lane.b32.xlu0 %v2996_v19, %s2900_s20 }
 0x659   :  { %1760 = vrot.lane.b32.xlu0 %v3005_v26, %s2900_s20  ;;  %v2723_v47 = vpop.eup %2722 }
 0x65a   :  { %v1099_v48 = vsel %vm577_vm3, %v2723_v47, 0.0  ;;  %v2725_v50 = vpop.eup %2724 }
 0x65b   :  { %v1303_v36 = vmul.f32 %v2725_v50, %v3271_v52 }
 0x65d   :  { %v1308_v55 = vmul.f32 %v1305_v13, %v1303_v36 }
 0x65f   :  { %v1313_v14 = vadd.f32 %v1310_v22, %v1308_v55 }
 0x672   :  { %1100 = vadd.xlane.f32.xlu1 %v1099_v48 }
 0x67c   :  { %v1098_v11 = vpop.xlane.xlu0 %1097 }
 0x67d   :  { %2726 = vrcp.f32 %v1098_v11 }
 0x680   :  { %v1109_v57 = vpop.permute.xlu0 %1108 }
 0x681   :  { %2579 = vmatpush3.msra.mxu0 %v1109_v57 }
 0x682   :  { %2580 = vmatprep.subr.mxu0 %v2894_v0 }
 0x683   :  { %1494 = vrot.lane.b32.xlu1 %v1313_v14, %s2897_s17 }
 0x684   :  { %v1107_v58 = vpop.permute.xlu0 %1106 }
 0x685   :  { %2581 = vmatpush3.msra.mxu0 %v1107_v58 }
 0x686   :  { %2592 = vmatprep.subr.mxu0 %v2894_v0 }
 0x687   :  { %1816 = vrot.lane.b32.xlu1 %v3003_v24, %s2900_s20 }
 0x68a   :  { %v2727_v42 = vpop.eup %2726 }
 0x68b   :  { %1814 = vrot.lane.b32.xlu1 %v3007_v27, %s2900_s20  ;;  %v1104_v52 = vmul.f32 %v2727_v42, %v3305_v46 }
 0x68d   :  { %2583 = vmatmul.mubr.msk.f32.vlgmr.msra.gmra.mxu0 %vm577_vm3, %v1104_v52 }
 0x68e   :  { %2596 = vmatprep.mubr.msk.f32.mxu0 %vm2895_vm2, %v2894_v0 }
 0x68f   :  { %1762 = vrot.lane.b32.xlu1 %v3013_v30, %s2900_s20 }
 0x6b1   :  { %v1416_v60 = vpop.permute.xlu0 %1415 }
 0x6b2   :  { %2593 = vmatpush3.xpose.msk.msra.mxu0 %vm309_vm1, %v1416_v60 }
 0x6b3   :  { %2594 = vmatprep.subr.mxu0 %v2894_v0 }
 0x6b7   :  { %v1501_v2 = vpop.permute.xlu1 %1500 }
 0x6bb   :  { %v1414_v43 = vpop.permute.xlu0 %1413 }
 0x6bc   :  { %2595 = vmatpush3.xpose.msk.msra.mxu0 %vm309_vm1, %v1414_v43 }
 0x6bd   :  { %2606 = vmatprep.subr.mxu0 %v2894_v0 }
 0x6bf   :  { %v1410_v61 = vpop.permute.xlu0 %1409 }
 0x6c0   :  { %2597 = vmatmul.mubr.msk.f32.vlgmr.msra.gmra.mxu0 %vm309_vm1, %v1410_v61  ;;  %v1499_v3 = vpop.permute.xlu1 %1498 }
 0x6c1   :  { %2610 = vmatprep.mubr.msk.f32.mxu0 %vm2895_vm2, %v2894_v0 }
 0x6c3   :  { %v1813_v46 = vpop.permute.xlu0 %1812 }
 0x6c4   :  { %v1825_v63 = vsel %vm309_vm1, %v1813_v46, 0.0 }
 0x6c5   :  { %1826 = vadd.xlane.f32.xlu0 %v1825_v63 }
 0x6c7   :  { %v1811_v18 = vpop.permute.xlu0 %1810 }
 0x6c8   :  { %v1822_v28 = vsel %vm309_vm1, %v1811_v18, 0.0 }
 0x6c9   :  { %1823 = vadd.xlane.f32.xlu0 %v1822_v28 }
 0x6cb   :  { %v1761_v10 = vpop.permute.xlu0 %1760 }
 0x6cc   :  { %v1766_v51 = vsel %vm309_vm1, %v1761_v10, 0.0 }
 0x6fb   :  { %v1101_v4 = vpop.xlane.xlu1 %1100 }
 0x6fc   :  { %2728 = vrcp.f32 %v1101_v4 }
 0x6ff   :  { %v1495_v5 = vpop.permute.xlu1 %1494 }
 0x703   :  { %v1817_v7 = vpop.permute.xlu1 %1816 }
 0x704   :  { %v1831_v49 = vsel %vm309_vm1, %v1817_v7, 0.0 }
 0x705   :  { %1832 = vadd.xlane.f32.xlu1 %v1831_v49 }
 0x707   :  { %v1815_v8 = vpop.permute.xlu1 %1814 }
 0x708   :  { %v1828_v9 = vsel %vm309_vm1, %v1815_v8, 0.0 }
 0x709   :  { %v2729_v59 = vpop.eup %2728  ;;  %1829 = vadd.xlane.f32.xlu0 %v1828_v9 }
 0x70a   :  { %v1105_v12 = vmul.f32 %v2729_v59, %v2723_v47 }
 0x70b   :  { %v1763_v13 = vpop.permute.xlu1 %1762 }
 0x70c   :  { %v1769_v15 = vsel %vm309_vm1, %v1763_v13, 0.0  ;;  %2590 = vmatmul.mubr.msk.f32.vlgmr.msra.gmra.mxu1 %vm577_vm3, %v1105_v12 }
 0x70d   :  { %2600 = vmatpush3.xpose.msk.msra.mxu1 %vm309_vm1, %v1501_v2  ;;  %1767 = vadd.xlane.f32.xlu0 %v1766_v51 }
 0x70e   :  { %1770 = vadd.xlane.f32.xlu1 %v1769_v15  ;;  %2601 = vmatprep.subr.mxu1 %v2894_v0 }
 0x70f   :  { %2603 = vmatprep.mubr.msk.f32.mxu1 %vm2895_vm2, %v2894_v0 }
 0x711   :  { %2602 = vmatpush3.xpose.msk.msra.mxu1 %vm309_vm1, %v1499_v3 }
 0x712   :  { %2613 = vmatprep.subr.mxu1 %v2894_v0 }
 0x714   :  { %2604 = vmatmul.mubr.msk.f32.vlgmr.msra.gmra.mxu1 %vm309_vm1, %v1495_v5 }
 0x715   :  { %2617 = vmatprep.mubr.msk.f32.mxu1 %vm2895_vm2, %v2894_v0 }
 0x74d   :  { %v3368_v17 = vpop.f32.mrf.mxu0 }
 0x74e   :  { %v1827_v20 = vpop.xlane.xlu0 %1826 }
 0x74f   :  { %v1835_v22 = vmul.f32 0.125, %v1827_v20  ;;  %v2584_v23 = vpop.f32.mrf.mxu0 }
 0x751   :  { %v3371_v53 = vsub.f32 %v2994_v16, %v1835_v22 }
 0x752   :  { %v1824_v32 = vpop.xlane.xlu0 %1823 }
 0x753   :  { %v1843_v25 = vmul.f32 %v3371_v53, %v3371_v53  ;;  %v1834_v33 = vmul.f32 0.125, %v1824_v32 }
 0x755   :  { %1852 = vrot.lane.b32.xlu0 %v1843_v25, %s2900_s20  ;;  %v3380_v41 = vsub.f32 %v2996_v19, %v1834_v33 }
 0x757   :  { %v1842_v45 = vmul.f32 %v3380_v41, %v3380_v41 }
 0x780   :  { %v1489_v29 = vpop.f32.mrf.mxu0 }
 0x782   :  { %v2598_v31 = vpop.f32.mrf.mxu0 }
 0x78e   :  { %v1833_v21 = vpop.xlane.xlu1 %1832 }
 0x78f   :  { %v1837_v39 = vmul.f32 0.125, %v1833_v21 }
 0x791   :  { %v3377_v62 = vsub.f32 %v3003_v24, %v1837_v39 }
 0x792   :  { %v1830_v40 = vpop.xlane.xlu0 %1829 }
 0x793   :  { %v1845_v35 = vmul.f32 %v3377_v62, %v3377_v62  ;;  %v1836_v6 = vmul.f32 0.125, %v1830_v40 }
 0x795   :  { %1856 = vrot.lane.b32.xlu1 %v1845_v35, %s2900_s20  ;;  %v3388_v47 = vsub.f32 %v3007_v27, %v1836_v6 }
 0x796   :  { %v1768_v44 = vpop.xlane.xlu0 %1767 }
 0x797   :  { %v1772_v48 = vmul.f32 0.125, %v1768_v44  ;;  %v1771_v50 = vpop.xlane.xlu1 %1770  ;;  %v1844_v55 = vmul.f32 %v3388_v47, %v3388_v47 }
 0x798   :  { %v1773_v36 = vmul.f32 0.125, %v1771_v50 }
 0x799   :  { %v3391_v11 = vsub.f32 %v3005_v26, %v1772_v48  ;;  %1850 = vrot.lane.b32.xlu1 %v1842_v45, %s2900_s20  ;;  %v1578_v26 = vmul.f32 0.35355338, %v1489_v29 }
 0x79a   :  { %v3399_v14 = vsub.f32 %v3013_v30, %v1773_v36 }
 0x79b   :  { %v1776_v57 = vmul.f32 %v3391_v11, %v3391_v11  ;;  %v1580_v42 = vsel %vm577_vm3, %v1578_v26, -inf }
 0x79c   :  { %v1777_v58 = vmul.f32 %v3399_v14, %v3399_v14 }
 0x79d   :  { %1780 = vrot.lane.b32.xlu0 %v1776_v57, %s2900_s20  ;;  %1854 = vrot.lane.b32.xlu1 %v1844_v55, %s2900_s20 }
 0x7a1   :  { %1782 = vrot.lane.b32.xlu1 %v1777_v58, %s2900_s20 }
 0x7bc   :  { %1581 = vmax.xlane.f32.xlu0 %v1580_v42 }
 0x7c7   :  { %v1853_v52 = vpop.permute.xlu0 %1852 }
 0x7c8   :  { %v1865_v60 = vsel %vm309_vm1, %v1853_v52, 0.0 }
 0x7c9   :  { %1866 = vadd.xlane.f32.xlu0 %v1865_v60 }
 0x7cc   :  { %v3408_v43 = vpop.f32.mrf.mxu1 }
 0x7ce   :  { %v2591_v30 = vpop.f32.mrf.mxu1 }
 0x7d4   :  { %v1574_v61 = vpop.f32.mrf.mxu1 }
 0x7d5   :  { %v3410_v46 = vmul.f32 0.35355338, %v1574_v61 }
 0x7d6   :  { %v2605_v63 = vpop.f32.mrf.mxu1 }
 0x7d7   :  { %v1583_v18 = vsel %vm577_vm3, %v3410_v46, -inf }
 0x7d8   :  { %1584 = vmax.xlane.f32.xlu1 %v1583_v18 }
 0x807   :  { %v1857_v28 = vpop.permute.xlu1 %1856 }
 0x808   :  { %v1871_v2 = vsel %vm309_vm1, %v1857_v28, 0.0 }
 0x809   :  { %1872 = vadd.xlane.f32.xlu0 %v1871_v2 }
 0x80b   :  { %v1851_v3 = vpop.permute.xlu1 %1850 }
 0x80c   :  { %v1862_v4 = vsel %vm309_vm1, %v1851_v3, 0.0 }
 0x80d   :  { %1863 = vadd.xlane.f32.xlu0 %v1862_v4 }
 0x80f   :  { %v1781_v5 = vpop.permute.xlu0 %1780  ;;  %v1855_v7 = vpop.permute.xlu1 %1854 }
 0x810   :  { %v1786_v49 = vsel %vm309_vm1, %v1781_v5, 0.0  ;;  %v1868_v8 = vsel %vm309_vm1, %v1855_v7, 0.0 }
 0x811   :  { %1787 = vadd.xlane.f32.xlu0 %v1786_v49  ;;  %1869 = vadd.xlane.f32.xlu1 %v1868_v8 }
 0x813   :  { %v1783_v9 = vpop.permute.xlu1 %1782 }
 0x814   :  { %v1789_v59 = vsel %vm309_vm1, %v1783_v9, 0.0 }
 0x815   :  { %1790 = vadd.xlane.f32.xlu1 %v1789_v59 }
 0x826   :  { %1897 = vrot.lane.b32.xlu1 %v3083_v38, %s2901_s21 }
 0x827   :  { %1890 = vrot.lane.b32.xlu0 %v3080_v34, %s2901_s21 }
 0x82a   :  { %1800 = vrot.lane.b32.xlu1 %v3093_v56, %s2901_s21 }
 0x82e   :  { %1805 = vrot.lane.b32.xlu1 %v3101_v1, %s2901_s21 }
 0x832   :  { %1683 = vrot.lane.b32.xlu1 %v3003_v24, %s2902_s22 }
 0x836   :  { %1681 = vrot.lane.b32.xlu1 %v3007_v27, %s2902_s22 }
 0x845   :  { %v1582_v10 = vpop.xlane.xlu0 %1581 }
 0x846   :  { %v1586_v12 = vsub.f32 %v1578_v26, %v1582_v10 }
 0x848   :  { %v1588_v13 = vmul.f32 1.442695, %v1586_v12 }
 0x84a   :  { %2730 = vpow2.f32 %v1588_v13 }
 0x852   :  { %v1867_v38 = vpop.xlane.xlu0 %1866 }
 0x853   :  { %v1875_v56 = vmul.f32 0.125, %v1867_v38 }
 0x855   :  { %v1879_v1 = vadd.f32 1e-06, %v1875_v56 }
 0x857   :  { %v3429_v51 = vpop.eup %2730  ;;  %2732 = vrsqrt.f32 %v1879_v1 }
 0x858   :  { %v1592_v34 = vsel %vm577_vm3, %v3429_v51, 0.0 }
 0x859   :  { %1593 = vadd.xlane.f32.xlu0 %v1592_v34 }
 0x861   :  { %v1585_v23 = vpop.xlane.xlu1 %1584 }
 0x864   :  { %v2733_v40 = vpop.eup %2732 }
 0x865   :  { %v1887_v48 = vmul.f32 %v2733_v40, %v3371_v53 }
 0x86f   :  { %1604 = vrot.lane.b32.xlu0 %v2994_v16, %s2902_s22 }
 0x873   :  { %1602 = vrot.lane.b32.xlu0 %v2996_v19, %s2902_s22 }
 0x892   :  { %v1873_v15 = vpop.xlane.xlu0 %1872 }
 0x893   :  { %v1877_v20 = vmul.f32 0.125, %v1873_v15 }
 0x895   :  { %v1881_v22 = vadd.f32 1e-06, %v1877_v20 }
 0x896   :  { %v1864_v25 = vpop.xlane.xlu0 %1863 }
 0x897   :  { %2734 = vrsqrt.f32 %v1881_v22  ;;  %v1874_v29 = vmul.f32 0.125, %v1864_v25 }
 0x899   :  { %v1878_v31 = vadd.f32 1e-06, %v1874_v29 }
 0x89a   :  { %v1788_v32 = vpop.xlane.xlu0 %1787  ;;  %v1870_v21 = vpop.xlane.xlu1 %1869 }
 0x89b   :  { %2736 = vrsqrt.f32 %v1878_v31  ;;  %v1792_v33 = vmul.f32 0.125, %v1788_v32  ;;  %v1876_v39 = vmul.f32 0.125, %v1870_v21 }
 0x89d   :  { %v1794_v35 = vadd.f32 1e-06, %v1792_v33  ;;  %v1880_v6 = vadd.f32 1e-06, %v1876_v39 }
 0x89e   :  { %v1891_v44 = vpop.permute.xlu0 %1890  ;;  %v1791_v45 = vpop.xlane.xlu1 %1790 }
 0x89f   :  { %2738 = vrsqrt.f32 %v1794_v35  ;;  %v1894_v50 = vmul.f32 %v1891_v44, %v1887_v48  ;;  %v1793_v8 = vmul.f32 0.125, %v1791_v45 }
 0x8a0   :  { %2740 = vrsqrt.f32 %v1880_v6 }
 0x8a1   :  { %v1795_v9 = vadd.f32 1e-06, %v1793_v8 }
 0x8a2   :  { %v1898_v36 = vpop.permute.xlu1 %1897 }
 0x8a3   :  { %v1901_v55 = vadd.f32 %v1898_v36, %v1894_v50 }
 0x8a4   :  { %v2735_v57 = vpop.eup %2734 }
 0x8a5   :  { %v1889_v58 = vmul.f32 %v2735_v57, %v3377_v62  ;;  %1911 = vrot.lane.b32.xlu0 %v1901_v55, %s2900_s20 }
 0x8a6   :  { %v1801_v26 = vpop.permute.xlu1 %1800 }
 0x8a7   :  { %v1896_v42 = vmul.f32 %v1891_v44, %v1889_v58 }
 0x8a8   :  { %v2737_v52 = vpop.eup %2736 }
 0x8a9   :  { %v1886_v60 = vmul.f32 %v2737_v52, %v3380_v41  ;;  %v1903_v30 = vadd.f32 %v1898_v36, %v1896_v42 }
 0x8aa   :  { %v1806_v61 = vpop.permute.xlu1 %1805 }
 0x8ab   :  { %v1893_v63 = vmul.f32 %v1891_v44, %v1886_v60  ;;  %1996 = vrot.lane.b32.xlu1 %v1903_v30, %s2900_s20 }
 0x8ac   :  { %v2739_v53 = vpop.eup %2738 }
 0x8ad   :  { %v2741_v18 = vpop.eup %2740  ;;  %v1900_v28 = vadd.f32 %v1898_v36, %v1893_v63  ;;  %v1798_v2 = vmul.f32 %v2739_v53, %v3391_v11 }
 0x8ae   :  { %v1888_v3 = vmul.f32 %v2741_v18, %v3388_v47  ;;  %v1684_v62 = vpop.permute.xlu1 %1683  ;;  %v1587_v47 = vsub.f32 %v3410_v46, %v1585_v23 }
 0x8af   :  { %v1803_v4 = vmul.f32 %v1801_v26, %v1798_v2  ;;  %1909 = vrot.lane.b32.xlu0 %v1900_v28, %s2900_s20  ;;  %2614 = vmatpush3.msra.mxu1 %v1684_v62 }
 0x8b0   :  { %v1895_v5 = vmul.f32 %v1891_v44, %v1888_v3  ;;  %2615 = vmatprep.subr.mxu1 %v2894_v0  ;;  %v1590_v11 = vmul.f32 1.442695, %v1587_v47 }
 0x8b1   :  { %v1808_v41 = vadd.f32 %v1806_v61, %v1803_v4 }
 0x8b2   :  { %v1902_v7 = vadd.f32 %v1898_v36, %v1895_v5  ;;  %v1682_v49 = vpop.permute.xlu1 %1681  ;;  %2742 = vpow2.f32 %v1590_v11  ;;  %v2289_v5 = vld [vmem:[#allocation10 + $0x10] sm:$0xff] }
 0x8b3   :  { %1905 = vrot.lane.b32.xlu0 %v1808_v41, %s2900_s20  ;;  %2616 = vmatpush3.msra.mxu1 %v1682_v49  ;;  %2744 = vrsqrt.f32 %v1795_v9  ;;  %v2288_v41 = vld [vmem:[#allocation10 + $0x8] sm:$0xff] }
 0x8b4   :  { %1994 = vrot.lane.b32.xlu1 %v1902_v7, %s2900_s20  ;;  %2627 = vmatprep.subr.mxu1 %v2894_v0  ;;  %v2287_v7 = vld [vmem:[#allocation10] sm:$0xff] }
 0x8bf   :  { %v2743_v59 = vpop.eup %2742 }
 0x8c0   :  { %v1595_v10 = vsel %vm577_vm3, %v2743_v59, 0.0  ;;  %v2745_v12 = vpop.eup %2744 }
 0x8c1   :  { %v1799_v13 = vmul.f32 %v2745_v12, %v3399_v14 }
 0x8c3   :  { %v1804_v38 = vmul.f32 %v1801_v26, %v1799_v13 }
 0x8c5   :  { %v1809_v1 = vadd.f32 %v1806_v61, %v1804_v38 }
 0x8d8   :  { %1596 = vadd.xlane.f32.xlu1 %v1595_v10 }
 0x8e2   :  { %v1594_v34 = vpop.xlane.xlu0 %1593 }
 0x8e3   :  { %2746 = vrcp.f32 %v1594_v34 }
 0x8e6   :  { %v1605_v56 = vpop.permute.xlu0 %1604 }
 0x8e7   :  { %2607 = vmatpush3.msra.mxu0 %v1605_v56 }
 0x8e8   :  { %2608 = vmatprep.subr.mxu0 %v2894_v0 }
 0x8e9   :  { %1990 = vrot.lane.b32.xlu1 %v1809_v1, %s2900_s20 }
 0x8ea   :  { %v1603_v46 = vpop.permute.xlu0 %1602 }
 0x8eb   :  { %2609 = vmatpush3.msra.mxu0 %v1603_v46 }
 0x8ec   :  { %2620 = vmatprep.subr.mxu0 %v2894_v0 }
 0x8f0   :  { %v2747_v15 = vpop.eup %2746 }
 0x8f1   :  { %v1600_v20 = vmul.f32 %v2747_v15, %v3429_v51 }
 0x8f3   :  { %2611 = vmatmul.mubr.msk.f32.vlgmr.msra.gmra.mxu0 %vm577_vm3, %v1600_v20 }
 0x8f4   :  { %2624 = vmatprep.mubr.msk.f32.mxu0 %vm2895_vm2, %v2894_v0 }
 0x917   :  { %v1912_v14 = vpop.permute.xlu0 %1911 }
 0x918   :  { %2621 = vmatpush3.xpose.msk.msra.mxu0 %vm309_vm1, %v1912_v14 }
 0x919   :  { %2622 = vmatprep.subr.mxu0 %v2894_v0 }
 0x91d   :  { %v1997_v51 = vpop.permute.xlu1 %1996 }
 0x921   :  { %v1910_v22 = vpop.permute.xlu0 %1909 }
 0x922   :  { %2623 = vmatpush3.xpose.msk.msra.mxu0 %vm309_vm1, %v1910_v22 }
 0x923   :  { %2634 = vmatprep.subr.mxu0 %v2894_v0 }
 0x925   :  { %v1906_v23 = vpop.permute.xlu0 %1905 }
 0x926   :  { %2625 = vmatmul.mubr.msk.f32.vlgmr.msra.gmra.mxu0 %vm309_vm1, %v1906_v23  ;;  %v1995_v25 = vpop.permute.xlu1 %1994 }
 0x927   :  { %2638 = vmatprep.mubr.msk.f32.mxu0 %vm2895_vm2, %v2894_v0 }
 0x961   :  { %v1597_v29 = vpop.xlane.xlu1 %1596 }
 0x962   :  { %2748 = vrcp.f32 %v1597_v29 }
 0x965   :  { %v1991_v21 = vpop.permute.xlu1 %1990 }
 0x96f   :  { %v2749_v31 = vpop.eup %2748 }
 0x970   :  { %v1601_v32 = vmul.f32 %v2749_v31, %v2743_v59 }
 0x972   :  { %2618 = vmatmul.mubr.msk.f32.vlgmr.msra.gmra.mxu1 %vm577_vm3, %v1601_v32 }
 0x973   :  { %2628 = vmatpush3.xpose.msk.msra.mxu1 %vm309_vm1, %v1997_v51  ;;  %2631 = vmatprep.mubr.msk.f32.mxu1 %vm2895_vm2, %v2894_v0 }
 0x974   :  { %2629 = vmatprep.subr.mxu1 %v2894_v0 }
 0x977   :  { %2630 = vmatpush3.xpose.msk.msra.mxu1 %vm309_vm1, %v1995_v25 }
 0x978   :  { %2641 = vmatprep.subr.mxu1 %v2894_v0 }
 0x97a   :  { %2632 = vmatmul.mubr.msk.f32.vlgmr.msra.gmra.mxu1 %vm309_vm1, %v1991_v21 }
 0x97b   :  { %2645 = vmatprep.mubr.msk.f32.mxu1 %vm2895_vm2, %v2894_v0 }
 0x9b3   :  { %v1677_v33 = vpop.f32.mrf.mxu0 }
 0x9b5   :  { %v2612_v39 = vpop.f32.mrf.mxu0 }
 0x9e6   :  { %v1985_v40 = vpop.f32.mrf.mxu0 }
 0x9e7   :  { %v2074_v35 = vmul.f32 0.35355338, %v1985_v40 }
 0x9e8   :  { %v2626_v6 = vpop.f32.mrf.mxu0 }
 0x9e9   :  { %v2076_v44 = vsel %vm577_vm3, %v2074_v35, -inf }
 0x9ea   :  { %2077 = vmax.xlane.f32.xlu0 %v2076_v44 }
 0xa32   :  { %v1756_v45 = vpop.f32.mrf.mxu1 }
 0xa34   :  { %v2619_v48 = vpop.f32.mrf.mxu1 }
 0xa3a   :  { %v2070_v50 = vpop.f32.mrf.mxu1 }
 0xa3b   :  { %v2075_v36 = vmul.f32 0.35355338, %v2070_v50 }
 0xa3c   :  { %v2633_v55 = vpop.f32.mrf.mxu1 }
 0xa3d   :  { %v2079_v57 = vsel %vm577_vm3, %v2075_v36, -inf }
 0xa3e   :  { %2080 = vmax.xlane.f32.xlu1 %v2079_v57 }
 0xa4f   :  { %2179 = vrot.lane.b32.xlu1 %v3003_v24, %s2903_s23 }
 0xa53   :  { %2098 = vrot.lane.b32.xlu1 %v2996_v19, %s2903_s23 }
 0xa57   :  { %2177 = vrot.lane.b32.xlu1 %v3007_v27, %s2903_s23 }
 0xa5b   :  { %2260 = vrot.lane.b32.xlu1 %v3408_v43, %s2889_s15 }
 0xa5f   :  { %2268 = vrot.lane.b32.xlu1 %v1756_v45, %s2898_s18 }
 0xa73   :  { %v2078_v58 = vpop.xlane.xlu0 %2077 }
 0xa74   :  { %v2082_v26 = vsub.f32 %v2074_v35, %v2078_v58 }
 0xa76   :  { %v2084_v42 = vmul.f32 1.442695, %v2082_v26 }
 0xa78   :  { %2750 = vpow2.f32 %v2084_v42 }
 0xa85   :  { %v2751_v52 = vpop.eup %2750 }
 0xa86   :  { %v2088_v60 = vsel %vm577_vm3, %v2751_v52, 0.0 }
 0xa87   :  { %2089 = vadd.xlane.f32.xlu0 %v2088_v60 }
 0xac7   :  { %v2081_v30 = vpop.xlane.xlu1 %2080 }
 0xac8   :  { %v2083_v61 = vsub.f32 %v2075_v36, %v2081_v30 }
 0xaca   :  { %v2086_v24 = vmul.f32 1.442695, %v2083_v61 }
 0xacb   :  { %v2180_v63 = vpop.permute.xlu1 %2179 }
 0xacc   :  { %2752 = vpow2.f32 %v2086_v24  ;;  %2642 = vmatpush3.msra.mxu1 %v2180_v63 }
 0xacd   :  { %2643 = vmatprep.subr.mxu1 %v2894_v0 }
 0xacf   :  { %v2099_v19 = vpop.permute.xlu1 %2098 }
 0xad3   :  { %v2178_v27 = vpop.permute.xlu1 %2177 }
 0xad4   :  { %2644 = vmatpush3.msra.mxu1 %v2178_v27 }
 0xad7   :  { %v2261_v59 = vpop.permute.xlu1 %2260 }
 0xad8   :  { %v2281_v56 = vsel %vm309_vm1, %v3283_v37, %v2261_v59 }
 0xad9   :  { %v2753_v43 = vpop.eup %2752 }
 0xada   :  { %v2091_v53 = vsel %vm577_vm3, %v2753_v43, 0.0 }
 0xadb   :  { %2092 = vadd.xlane.f32.xlu0 %v2091_v53  ;;  %v2269_v38 = vpop.permute.xlu1 %2268 }
 0xadc   :  { %v2283_v1 = vsel %vm577_vm3, %v2281_v56, %v2269_v38 }
 0xaf1   :  { %2100 = vrot.lane.b32.xlu0 %v2994_v16, %s2903_s23 }
 0xaf5   :  { %2258 = vrot.lane.b32.xlu0 %v3368_v17, %s2889_s15  ;;  %v2290_v17 = vld [vmem:[#allocation10 + $0x18] sm:$0xff] }
 0xaf9   :  { %2266 = vrot.lane.b32.xlu0 %v1677_v33, %s2898_s18 }
 0xb10   :  { %v2090_v18 = vpop.xlane.xlu0 %2089 }
 0xb11   :  { %2754 = vrcp.f32 %v2090_v18 }
 0xb1e   :  { %v2755_v2 = vpop.eup %2754 }
 0xb1f   :  { %v2096_v62 = vmul.f32 %v2755_v2, %v2751_v52 }
 0xb64   :  { %v2093_v28 = vpop.xlane.xlu0 %2092 }
 0xb65   :  { %2756 = vrcp.f32 %v2093_v28 }
 0xb68   :  { %v2101_v3 = vpop.permute.xlu0 %2100 }
 0xb69   :  { %2635 = vmatpush3.msra.mxu0 %v2101_v3 }
 0xb6a   :  { %2636 = vmatprep.subr.mxu0 %v2894_v0 }
 0xb6b   :  { %2637 = vmatpush3.msra.mxu0 %v2099_v19 }
 0xb6c   :  { %2639 = vmatmul.mubr.msk.f32.vlgmr.msra.gmra.mxu0 %vm577_vm3, %v2096_v62  ;;  %2648 = vmatprep.subr.mxu0 %v2290_v17  ;;  %v2259_v8 = vpop.permute.xlu0 %2258 }
 0xb6d   :  { %2649 = vmatpush3.msra.mxu0 %v2290_v17  ;;  %v2280_v10 = vsel %vm309_vm1, %v3250_v54, %v2259_v8  ;;  %v2440_v54 = vld [vmem:[%s3520_s7] ss:$0 sm:$0xff] }
 0xb6e   :  { %2650 = vmatprep.subr.mxu0 %v2289_v5 }
 0xb6f   :  { %2651 = vmatpush3.msra.mxu0 %v2289_v5 }
 0xb70   :  { %2652 = vmatprep.subr.mxu0 %v2288_v41  ;;  %v2267_v9 = vpop.permute.xlu0 %2266 }
 0xb71   :  { %2653 = vmatpush3.msra.mxu0 %v2288_v41  ;;  %v2282_v12 = vsel %vm577_vm3, %v2280_v10, %v2267_v9 }
 0xb72   :  { %v2757_v4 = vpop.eup %2756  ;;  %2654 = vmatprep.subr.mxu0 %v2287_v7 }
 0xb73   :  { %v2097_v16 = vmul.f32 %v2757_v4, %v2753_v43  ;;  %2655 = vmatpush3.msra.mxu0 %v2287_v7 }
 0xb75   :  { %2646 = vmatmul.mubr.msk.f32.vlgmr.msra.gmra.mxu1 %vm577_vm3, %v2097_v16 }
 0xc2c   :  { %v2173_v0 = vpop.f32.mrf.mxu0 }
 0xc2d   :  { %2274 = vrot.lane.b32.xlu0 %v2173_v0, %s2901_s21 }
 0xc2e   :  { %v2640_v49 = vpop.f32.mrf.mxu0 }
 0xc35   :  { %v2252_v47 = vpop.f32.mrf.mxu1 }
 0xc36   :  { %2276 = vrot.lane.b32.xlu1 %v2252_v47, %s2901_s21 }
 0xc37   :  { %v2647_v11 = vpop.f32.mrf.mxu1 }
 0xc9f   :  { %v2275_v13 = vpop.permute.xlu0 %2274 }
 0xca0   :  { %v2285_v34 = vsel %vm2284_vm4, %v2282_v12, %v2275_v13 }
 0xca1   :  { %2656 = vmatprep.mubr.msk.f32.mxu0 %vm118_vm0, %v2285_v34 }
 0xca8   :  { %v2277_v46 = vpop.permute.xlu1 %2276 }
 0xca9   :  { %v2286_v15 = vsel %vm2284_vm4, %v2283_v1, %v2277_v46 }
 0xcaa   :  { %2657 = vmatmul.mubr.msk.f32.vlgmr.msra.gmra.mxu0 %vm118_vm0, %v2286_v15 }
 0xd6a   :  { %v2658_v20 = vpop.f32.mrf.mxu0 }
 0xd6b   :  { %v2376_v14 = vadd.f32 %v2658_v20, %v2440_v54 }
 0xd6c   :  { %v2370_v22 = vpop.f32.mrf.mxu0 }
 0xd6d   :  { %2380 = vst.msk [vmem:[#allocation11 + $0x8] sm:$0xff] %vm118_vm0, %v2376_v14  ;;  %v2371_v23 = vadd.f32 %v2440_v54, %v2370_v22 }
 0xd6f   :  { %2379 = vst.msk [vmem:[#allocation11] sm:$0xff] %vm118_vm0, %v2371_v23 }
 0xd70   :  { %2869 = shalt.err (!%p2866_p1)
}
 0xd71   :  { %2392 = dma.vmem_to_hbm [thread:$0]  %s2387_s26, 256, %s3522_s9, [#allocation4], %s2888_s14, %s2888_s14, %s2889_s15  }
 0xd72   :  { %2884 = dma.done.wait [#allocation4], 256  }
 0xd73   :  { %2885 = vsyncadd [#allocation4], 4294967040 }
 0xd74   :  { %2396 = vsyncpa [#allocation3], 1 }
 0xd75   :  { %2397 = vsyncpa [#allocation6], 1 }
 0xd76   :  { %2398 = vsyncpa [#allocation9], 1 }
 0xd77   :  { %2399 = vsyncpa [#allocation4], 1 }

</bundles_post_ra>
